<compile_context>
chip_gen: v7x
topology: tpu7x:2x2x1
jax: 0.10.0
libtpu: 0.0.40
codegen_flags: <defaults>
</compile_context>

<pallas_src>
import numpy as np
import jax
import jax.numpy as jnp
from jax.experimental import pallas as pl
from jax.experimental.pallas import tpu as pltpu

PERMUTE_NUMBER = 6
BN_EPS = 1e-5


def discriminator_kernel(x_ref, w1_ref, b1_ref, hd_ref,
                         perm_even_ref, perm_odd_ref,
                         w2f_ref, b2_ref, w3_ref, b3_ref, w4_ref, b4_ref,
                         prob_ref, feat_ref):
    x = x_ref[...]

    # map1 + tanh
    h1 = jnp.tanh(
        jnp.dot(x, w1_ref[...], preferred_element_type=jnp.float32) + b1_ref[...])

    # h1 @ hd followed by BatchNorm1d (full-batch statistics, identity affine).
    # Center once, reuse the centered tensor for variance and normalization.
    xh = jnp.dot(h1, hd_ref[...], preferred_element_type=jnp.float32)
    xc = xh - jnp.mean(xh, axis=0, keepdims=True)
    xs = xc * jax.lax.rsqrt(jnp.mean(xc * xc, axis=0, keepdims=True) + BN_EPS)

    # Fused permutation matmuls: two MXU pushes with N = 3H replace six serial
    # HxH matmuls; MaxPool1d(2, stride=2) over the permutation axis is the
    # element-wise max of the even-indexed and odd-indexed halves.
    y_even = jnp.dot(xs, perm_even_ref[...], preferred_element_type=jnp.float32)
    y_odd = jnp.dot(xs, perm_odd_ref[...], preferred_element_type=jnp.float32)
    m = jnp.maximum(y_even, y_odd)                                   # [B, 3H]

    # map2 with the pooled ".sum(2)" folded in (w2f = [W2; W2; W2]), then
    # BatchNorm1d + tanh.
    h2 = jnp.dot(m, w2f_ref[...], preferred_element_type=jnp.float32) + b2_ref[...]
    h2c = h2 - jnp.mean(h2, axis=0, keepdims=True)
    h2 = jnp.tanh(
        h2c * jax.lax.rsqrt(jnp.mean(h2c * h2c, axis=0, keepdims=True) + BN_EPS))

    # map3 + relu
    h3 = jnp.maximum(
        jnp.dot(h2, w3_ref[...], preferred_element_type=jnp.float32) + b3_ref[...],
        0.0)

    # map4 + sigmoid
    logits = jnp.dot(h3, w4_ref[...], preferred_element_type=jnp.float32) + b4_ref[...]
    prob_ref[...] = jax.nn.sigmoid(logits)
    feat_ref[...] = h3


def discriminator_forward(x, params):
    B = x.shape[0]
    I = params["w1"].shape[0]
    H = params["w2"].shape[0]
    O = params["w4"].shape[1]

    # Host-side parameter re-layout (in a real training loop this is done once
    # per parameter update, not per forward call).
    perm = params["perm"]                                            # [P, H, H]
    perm_even = jnp.concatenate([perm[0], perm[2], perm[4]], axis=1)  # [H, 3H]
    perm_odd = jnp.concatenate([perm[1], perm[3], perm[5]], axis=1)   # [H, 3H]
    w2f = jnp.concatenate([params["w2"]] * 3, axis=0)                 # [3H, H]

    inputs = (x, params["w1"], params["b1"], params["hd"],
              perm_even, perm_odd, w2f, params["b2"],
              params["w3"], params["b3"], params["w4"], params["b4"])

    # Advisory cost estimate for the XLA scheduler.
    flops = 2 * B * (I * H        # map1
                     + H * H      # hd
                     + 2 * H * 3 * H  # fused even/odd permutation matmuls
                     + 3 * H * H  # folded map2
                     + H * H      # map3
                     + H * O)     # map4
    transcendentals = B * (2 * H + O) + 2 * H
    bytes_accessed = 4 * (sum(int(np.prod(a.shape)) for a in inputs)
                          + B * O + B * H)

    vmem = lambda: pl.BlockSpec(memory_space=pltpu.MemorySpace.VMEM)
    # Single invocation: full batch resident in VMEM (~tens of KiB), BatchNorm
    # statistics stay full-batch correct.
    return pl.pallas_call(
        discriminator_kernel,
        out_shape=(jax.ShapeDtypeStruct((B, O), jnp.float32),
                   jax.ShapeDtypeStruct((B, H), jnp.float32)),
        in_specs=[vmem() for _ in inputs],
        out_specs=(vmem(), vmem()),
        cost_estimate=pl.CostEstimate(flops=flops,
                                      transcendentals=transcendentals,
                                      bytes_accessed=bytes_accessed),
    )(*inputs)


def init_params(key, input_size, hidden_size, output_size):
    ks = jax.random.split(key, 9 + PERMUTE_NUMBER)

    def linear(kw, kb, fan_in, fan_out):
        bound = 1.0 / np.sqrt(fan_in)
        w = jax.random.uniform(kw, (fan_in, fan_out), jnp.float32, -bound, bound)
        b = jax.random.uniform(kb, (1, fan_out), jnp.float32, -bound, bound)
        return w, b

    w1, b1 = linear(ks[0], ks[1], input_size, hidden_size)
    w2, b2 = linear(ks[2], ks[3], hidden_size, hidden_size)
    w3, b3 = linear(ks[4], ks[5], hidden_size, hidden_size)
    w4, b4 = linear(ks[6], ks[7], hidden_size, output_size)

    # TODO(synk): real hd comes from jpw.create_haar_dictionary; deterministic
    # synthetic [H, H] matrix of the same shape/dtype is used instead.
    hd = jax.random.normal(ks[8], (hidden_size, hidden_size), jnp.float32)
    hd = hd / np.sqrt(hidden_size)

    # permuteTensor: P one-hot permutation matrices, eye(H)[perm, :]
    eye = jnp.eye(hidden_size, dtype=jnp.float32)
    perm_mats = []
    for p in range(PERMUTE_NUMBER):
        idx = jax.random.permutation(ks[9 + p], hidden_size)
        perm_mats.append(eye[idx, :])
    perm = jnp.stack(perm_mats, axis=0)

    return dict(w1=w1, b1=b1, w2=w2, b2=b2, w3=w3, b3=b3, w4=w4, b4=b4,
                hd=hd, perm=perm)


def reference_forward(x, p):
    """Plain-JAX reference, mirrors the PyTorch forward."""
    h1 = jnp.tanh(x @ p["w1"] + p["b1"])
    xh = h1 @ p["hd"]
    mu1 = jnp.mean(xh, axis=0, keepdims=True)
    var1 = jnp.mean((xh - mu1) ** 2, axis=0, keepdims=True)
    xs = (xh - mu1) / jnp.sqrt(var1 + BN_EPS)
    ys = jnp.einsum("bh,phk->pbk", xs, p["perm"])      # [P, B, H]
    ys = jnp.transpose(ys, (1, 2, 0))                  # [B, H, P]
    pooled = jnp.max(ys.reshape(ys.shape[0], ys.shape[1], -1, 2), axis=-1).sum(-1)
    h2 = pooled @ p["w2"] + p["b2"]
    mu2 = jnp.mean(h2, axis=0, keepdims=True)
    var2 = jnp.mean((h2 - mu2) ** 2, axis=0, keepdims=True)
    h2 = jnp.tanh((h2 - mu2) / jnp.sqrt(var2 + BN_EPS))
    h3 = jax.nn.relu(h2 @ p["w3"] + p["b3"])
    return jax.nn.sigmoid(h3 @ p["w4"] + p["b4"]), h3


if __name__ == "__main__":
    key = jax.random.PRNGKey(0)
    k_x, k_p = jax.random.split(key)

    # Batch raised to 128 (fills the MXU sublane/M dimension per the perf
    # review) while all other dims stay at the module's natural small sizes.
    batch, input_size, hidden_size, output_size = 128, 16, 32, 1
    params = init_params(k_p, input_size, hidden_size, output_size)
    x = jax.random.normal(k_x, (batch, input_size), jnp.float32)

    prob, feat = discriminator_forward(x, params)
    prob = jax.block_until_ready(prob)
    feat = jax.block_until_ready(feat)

    ref_prob, ref_feat = reference_forward(x, params)
    np.testing.assert_allclose(np.asarray(prob), np.asarray(ref_prob),
                               rtol=1e-4, atol=1e-4)
    np.testing.assert_allclose(np.asarray(feat), np.asarray(ref_feat),
                               rtol=1e-4, atol=1e-4)

    assert prob.shape == (batch, output_size) and feat.shape == (batch, hidden_size)
    print("KERNEL_OK")
</pallas_src>

<mosaic_0001>
module attributes {stable_mosaic.version = 11 : i64} {
  func.func @discriminator_kernel(%arg0: memref<128x16xf32, #tpu.memory_space<vmem>>, %arg1: memref<16x32xf32, #tpu.memory_space<vmem>>, %arg2: memref<1x32xf32, #tpu.memory_space<vmem>>, %arg3: memref<32x32xf32, #tpu.memory_space<vmem>>, %arg4: memref<32x96xf32, #tpu.memory_space<vmem>>, %arg5: memref<32x96xf32, #tpu.memory_space<vmem>>, %arg6: memref<96x32xf32, #tpu.memory_space<vmem>>, %arg7: memref<1x32xf32, #tpu.memory_space<vmem>>, %arg8: memref<32x32xf32, #tpu.memory_space<vmem>>, %arg9: memref<1x32xf32, #tpu.memory_space<vmem>>, %arg10: memref<32x1xf32, #tpu.memory_space<vmem>>, %arg11: memref<1x1xf32, #tpu.memory_space<vmem>>, %arg12: memref<128x1xf32, #tpu.memory_space<vmem>>, %arg13: memref<128x32xf32, #tpu.memory_space<vmem>>) attributes {dimension_semantics = [], scalar_prefetch = 0 : i64, scratch_operands = 0 : i64, tpu.core_type = #tpu.core_type<tc>} {
    %c0 = arith.constant 0 : index
    %c0_0 = arith.constant 0 : index
    %0 = vector.load %arg0[%c0, %c0_0] : memref<128x16xf32, #tpu.memory_space<vmem>>, vector<128x16xf32>
    %c0_1 = arith.constant 0 : index
    %c0_2 = arith.constant 0 : index
    %1 = vector.load %arg1[%c0_1, %c0_2] : memref<16x32xf32, #tpu.memory_space<vmem>>, vector<16x32xf32>
    %cst = arith.constant dense<0.000000e+00> : vector<128x32xf32>
    %2 = tpu.matmul %0, %1, %cst {dimension_numbers = #tpu.dot_dimension_numbers<[1], [0], [0], [1], [0, 0, 1, 1], [], []>} : vector<128x16xf32>, vector<16x32xf32>, vector<128x32xf32> -> vector<128x32xf32>
    %c0_3 = arith.constant 0 : index
    %c0_4 = arith.constant 0 : index
    %3 = vector.load %arg2[%c0_3, %c0_4] : memref<1x32xf32, #tpu.memory_space<vmem>>, vector<1x32xf32>
    %4 = vector.broadcast %3 : vector<1x32xf32> to vector<128x32xf32>
    %5 = arith.addf %2, %4 : vector<128x32xf32>
    %6 = math.tanh %5 : vector<128x32xf32>
    %c0_5 = arith.constant 0 : index
    %c0_6 = arith.constant 0 : index
    %7 = vector.load %arg3[%c0_5, %c0_6] : memref<32x32xf32, #tpu.memory_space<vmem>>, vector<32x32xf32>
    %cst_7 = arith.constant dense<0.000000e+00> : vector<128x32xf32>
    %8 = tpu.matmul %6, %7, %cst_7 {dimension_numbers = #tpu.dot_dimension_numbers<[1], [0], [0], [1], [0, 0, 1, 1], [], []>} : vector<128x32xf32>, vector<32x32xf32>, vector<128x32xf32> -> vector<128x32xf32>
    %cst_8 = arith.constant dense<0.000000e+00> : vector<32xf32>
    %9 = vector.multi_reduction <add>, %8, %cst_8 [0] : vector<128x32xf32> to vector<32xf32>
    %10 = vector.shape_cast %9 : vector<32xf32> to vector<1x32xf32>
    %cst_9 = arith.constant 1.280000e+02 : f32
    %11 = vector.broadcast %cst_9 : f32 to vector<1x32xf32>
    %12 = arith.divf %10, %11 : vector<1x32xf32>
    %13 = vector.broadcast %12 : vector<1x32xf32> to vector<128x32xf32>
    %14 = arith.subf %8, %13 : vector<128x32xf32>
    %15 = arith.mulf %14, %14 : vector<128x32xf32>
    %cst_10 = arith.constant dense<0.000000e+00> : vector<32xf32>
    %16 = vector.multi_reduction <add>, %15, %cst_10 [0] : vector<128x32xf32> to vector<32xf32>
    %17 = vector.shape_cast %16 : vector<32xf32> to vector<1x32xf32>
    %cst_11 = arith.constant 1.280000e+02 : f32
    %18 = vector.broadcast %cst_11 : f32 to vector<1x32xf32>
    %19 = arith.divf %17, %18 : vector<1x32xf32>
    %cst_12 = arith.constant 9.99999974E-6 : f32
    %20 = vector.broadcast %cst_12 : f32 to vector<1x32xf32>
    %21 = arith.addf %19, %20 : vector<1x32xf32>
    %22 = math.rsqrt %21 : vector<1x32xf32>
    %23 = vector.broadcast %22 : vector<1x32xf32> to vector<128x32xf32>
    %24 = arith.mulf %14, %23 : vector<128x32xf32>
    %c0_13 = arith.constant 0 : index
    %c0_14 = arith.constant 0 : index
    %25 = vector.load %arg4[%c0_13, %c0_14] : memref<32x96xf32, #tpu.memory_space<vmem>>, vector<32x96xf32>
    %cst_15 = arith.constant dense<0.000000e+00> : vector<128x96xf32>
    %26 = tpu.matmul %24, %25, %cst_15 {dimension_numbers = #tpu.dot_dimension_numbers<[1], [0], [0], [1], [0, 0, 1, 1], [], []>} : vector<128x32xf32>, vector<32x96xf32>, vector<128x96xf32> -> vector<128x96xf32>
    %c0_16 = arith.constant 0 : index
    %c0_17 = arith.constant 0 : index
    %27 = vector.load %arg5[%c0_16, %c0_17] : memref<32x96xf32, #tpu.memory_space<vmem>>, vector<32x96xf32>
    %cst_18 = arith.constant dense<0.000000e+00> : vector<128x96xf32>
    %28 = tpu.matmul %24, %27, %cst_18 {dimension_numbers = #tpu.dot_dimension_numbers<[1], [0], [0], [1], [0, 0, 1, 1], [], []>} : vector<128x32xf32>, vector<32x96xf32>, vector<128x96xf32> -> vector<128x96xf32>
    %29 = arith.maximumf %26, %28 : vector<128x96xf32>
    %c0_19 = arith.constant 0 : index
    %c0_20 = arith.constant 0 : index
    %30 = vector.load %arg6[%c0_19, %c0_20] : memref<96x32xf32, #tpu.memory_space<vmem>>, vector<96x32xf32>
    %cst_21 = arith.constant dense<0.000000e+00> : vector<128x32xf32>
    %31 = tpu.matmul %29, %30, %cst_21 {dimension_numbers = #tpu.dot_dimension_numbers<[1], [0], [0], [1], [0, 0, 1, 1], [], []>} : vector<128x96xf32>, vector<96x32xf32>, vector<128x32xf32> -> vector<128x32xf32>
    %c0_22 = arith.constant 0 : index
    %c0_23 = arith.constant 0 : index
    %32 = vector.load %arg7[%c0_22, %c0_23] : memref<1x32xf32, #tpu.memory_space<vmem>>, vector<1x32xf32>
    %33 = vector.broadcast %32 : vector<1x32xf32> to vector<128x32xf32>
    %34 = arith.addf %31, %33 : vector<128x32xf32>
    %cst_24 = arith.constant dense<0.000000e+00> : vector<32xf32>
    %35 = vector.multi_reduction <add>, %34, %cst_24 [0] : vector<128x32xf32> to vector<32xf32>
    %36 = vector.shape_cast %35 : vector<32xf32> to vector<1x32xf32>
    %cst_25 = arith.constant 1.280000e+02 : f32
    %37 = vector.broadcast %cst_25 : f32 to vector<1x32xf32>
    %38 = arith.divf %36, %37 : vector<1x32xf32>
    %39 = vector.broadcast %38 : vector<1x32xf32> to vector<128x32xf32>
    %40 = arith.subf %34, %39 : vector<128x32xf32>
    %41 = arith.mulf %40, %40 : vector<128x32xf32>
    %cst_26 = arith.constant dense<0.000000e+00> : vector<32xf32>
    %42 = vector.multi_reduction <add>, %41, %cst_26 [0] : vector<128x32xf32> to vector<32xf32>
    %43 = vector.shape_cast %42 : vector<32xf32> to vector<1x32xf32>
    %cst_27 = arith.constant 1.280000e+02 : f32
    %44 = vector.broadcast %cst_27 : f32 to vector<1x32xf32>
    %45 = arith.divf %43, %44 : vector<1x32xf32>
    %cst_28 = arith.constant 9.99999974E-6 : f32
    %46 = vector.broadcast %cst_28 : f32 to vector<1x32xf32>
    %47 = arith.addf %45, %46 : vector<1x32xf32>
    %48 = math.rsqrt %47 : vector<1x32xf32>
    %49 = vector.broadcast %48 : vector<1x32xf32> to vector<128x32xf32>
    %50 = arith.mulf %40, %49 : vector<128x32xf32>
    %51 = math.tanh %50 : vector<128x32xf32>
    %c0_29 = arith.constant 0 : index
    %c0_30 = arith.constant 0 : index
    %52 = vector.load %arg8[%c0_29, %c0_30] : memref<32x32xf32, #tpu.memory_space<vmem>>, vector<32x32xf32>
    %cst_31 = arith.constant dense<0.000000e+00> : vector<128x32xf32>
    %53 = tpu.matmul %51, %52, %cst_31 {dimension_numbers = #tpu.dot_dimension_numbers<[1], [0], [0], [1], [0, 0, 1, 1], [], []>} : vector<128x32xf32>, vector<32x32xf32>, vector<128x32xf32> -> vector<128x32xf32>
    %c0_32 = arith.constant 0 : index
    %c0_33 = arith.constant 0 : index
    %54 = vector.load %arg9[%c0_32, %c0_33] : memref<1x32xf32, #tpu.memory_space<vmem>>, vector<1x32xf32>
    %55 = vector.broadcast %54 : vector<1x32xf32> to vector<128x32xf32>
    %56 = arith.addf %53, %55 : vector<128x32xf32>
    %cst_34 = arith.constant 0.000000e+00 : f32
    %57 = vector.broadcast %cst_34 : f32 to vector<128x32xf32>
    %58 = arith.maximumf %56, %57 : vector<128x32xf32>
    %c0_35 = arith.constant 0 : index
    %c0_36 = arith.constant 0 : index
    %59 = vector.load %arg10[%c0_35, %c0_36] : memref<32x1xf32, #tpu.memory_space<vmem>>, vector<32x1xf32>
    %cst_37 = arith.constant dense<0.000000e+00> : vector<128x1xf32>
    %60 = tpu.matmul %58, %59, %cst_37 {dimension_numbers = #tpu.dot_dimension_numbers<[1], [0], [0], [1], [0, 0, 1, 1], [], []>} : vector<128x32xf32>, vector<32x1xf32>, vector<128x1xf32> -> vector<128x1xf32>
    %c0_38 = arith.constant 0 : index
    %c0_39 = arith.constant 0 : index
    %61 = vector.load %arg11[%c0_38, %c0_39] : memref<1x1xf32, #tpu.memory_space<vmem>>, vector<1x1xf32>
    %62 = vector.broadcast %61 : vector<1x1xf32> to vector<128x1xf32>
    %63 = arith.addf %60, %62 : vector<128x1xf32>
    %64 = arith.negf %63 : vector<128x1xf32>
    %65 = math.exp %64 : vector<128x1xf32>
    %cst_40 = arith.constant 1.000000e+00 : f32
    %66 = vector.broadcast %cst_40 : f32 to vector<128x1xf32>
    %67 = arith.addf %66, %65 : vector<128x1xf32>
    %68 = arith.divf %66, %67 : vector<128x1xf32>
    %c0_41 = arith.constant 0 : index
    %c0_42 = arith.constant 0 : index
    %69 = vector.load %arg12[%c0_41, %c0_42] : memref<128x1xf32, #tpu.memory_space<vmem>>, vector<128x1xf32>
    tpu.vector_store %arg12[%c0_41, %c0_42], %68 {strides = array<i32>} : memref<128x1xf32, #tpu.memory_space<vmem>>, vector<128x1xf32>,
    %c0_43 = arith.constant 0 : index
    %c0_44 = arith.constant 0 : index
    %70 = vector.load %arg13[%c0_43, %c0_44] : memref<128x32xf32, #tpu.memory_space<vmem>>, vector<128x32xf32>
    tpu.vector_store %arg13[%c0_43, %c0_44], %58 {strides = array<i32>} : memref<128x32xf32, #tpu.memory_space<vmem>>, vector<128x32xf32>,
    return
  }
}

</mosaic_0001>

<bundles_post_ra>
// kernel: tpu_custom_call.1
= control target key start
LH: loop header
LB: loop body
LE: loop exit
PB: predicated region body
PF: predicated region fallthrough
CT: control target
= control target key end

     0   :  { %vm70_vm0 = vcmask 130048   ;;  %vm284_vm1 = vcmask 261120   ;;  %vm986_vm2 = vcmask 785408   ;;  %vm1842_vm3 = vcmask 7168   ;;  %s3402_s1 = inlined_call_operand.vmem [shape: f32[16,32], index: 1, kind: input, shape index: {}]   ;;  %s3403_s0 = inlined_call_operand.vmem [shape: f32[128,16], index: 0, kind: input, shape index: {}]   ;;  %s3404_s3 = inlined_call_operand.vmem [shape: f32[32,32], index: 3, kind: input, shape index: {}]   ;;  %s3405_s2 = inlined_call_operand.vmem [shape: f32[1,32], index: 2, kind: input, shape index: {}]   ;;  %s3406_s5 = inlined_call_operand.vmem [shape: f32[32,96], index: 5, kind: input, shape index: {}]   ;;  %s3407_s4 = inlined_call_operand.vmem [shape: f32[32,96], index: 4, kind: input, shape index: {}]   ;;  %s3408_s6 = inlined_call_operand.vmem [shape: f32[96,32], index: 6, kind: input, shape index: {}]   ;;  %s3409_s7 = inlined_call_operand.vmem [shape: f32[1,32], index: 7, kind: input, shape index: {}]   ;;  %s3410_s8 = inlined_call_operand.vmem [shape: f32[32,32], index: 8, kind: input, shape index: {}]   ;;  %s3411_s10 = inlined_call_operand.vmem [shape: f32[32,1], index: 10, kind: input, shape index: {}]   ;;  %s3412_s11 = inlined_call_operand.<no memory space> [shape: f32[1,1], index: 11, kind: input, shape index: {}]   ;;  %s3413_s9 = inlined_call_operand.vmem [shape: f32[1,32], index: 9, kind: input, shape index: {}]   ;;  %s3414_s13 = inlined_call_operand.vmem [shape: f32[128,32], index: 13, kind: output, shape index: {1}]   ;;  %s3415_s12 = inlined_call_operand.vmem [shape: f32[128,1], index: 12, kind: output, shape index: {0}]  }
   0x1   :  { %v61_v0 = vld [vmem:[%s3402_s1] sm:$0xff]  ;;  %v62_v1 = vld [vmem:[%s3402_s1 + $0x8] sm:$0xff]  ;;  %v47_v7 = vld [vmem:[%s3403_s0 + $0x10] sm:$0xff] }
   0x2   :  { %v45_v2 = vld [vmem:[%s3403_s0] sm:$0xff]  ;;  %v2397_v3 = vpack.c.bf16 %v62_v1, %v61_v0  ;;  %v46_v5 = vld [vmem:[%s3403_s0 + $0x8] sm:$0xff]  ;;  %v55_v8 = vld [vmem:[%s3403_s0 + $0x50] sm:$0xff] }
   0x3   :  { %2165 = vmatprep.mubr.msk.f32.mxu0 %vm70_vm0, %v45_v2  ;;  %v53_v4 = vld [vmem:[%s3403_s0 + $0x40] sm:$0xff]  ;;  %v54_v6 = vld [vmem:[%s3403_s0 + $0x48] sm:$0xff]  ;;  %v48_v12 = vld [vmem:[%s3403_s0 + $0x18] sm:$0xff] }
   0x4   :  { %2398 = vmatprep.subr.bf16.mxu0 %v2397_v3  ;;  %2465 = vmatprep.subr.bf16.mxu1 %v2397_v3  ;;  %v280_v9 = vld [vmem:[%s3404_s3] sm:$0xff]  ;;  %v281_v10 = vld [vmem:[%s3404_s3 + $0x8] sm:$0xff]  ;;  %v56_v13 = vld [vmem:[%s3403_s0 + $0x58] sm:$0xff] }
   0x5   :  { %2400 = vmatpush3.bf16.msra.mxu0 %v2397_v3  ;;  %2466 = vmatpush3.bf16.msra.mxu1 %v2397_v3  ;;  %v2401_v11 = vpack.c.bf16 %v281_v10, %v280_v9  ;;  %v49_v14 = vld [vmem:[%s3403_s0 + $0x20] sm:$0xff]  ;;  %v50_v16 = vld [vmem:[%s3403_s0 + $0x28] sm:$0xff]  ;;  %v51_v18 = vld [vmem:[%s3403_s0 + $0x30] sm:$0xff] }
   0x6   :  { %2177 = vmatprep.mubr.msk.f32.mxu1 %vm70_vm0, %v53_v4  ;;  %v57_v15 = vld [vmem:[%s3403_s0 + $0x60] sm:$0xff]  ;;  %v58_v17 = vld [vmem:[%s3403_s0 + $0x68] sm:$0xff]  ;;  %v59_v19 = vld [vmem:[%s3403_s0 + $0x70] sm:$0xff] }
   0x7   :  { %2402 = vmatprep.subr.bf16.mxu1 %v2401_v11  ;;  %v52_v20 = vld [vmem:[%s3403_s0 + $0x38] sm:$0xff]  ;;  %v282_v22 = vld [vmem:[%s3404_s3 + $0x10] sm:$0xff]  ;;  %v2754_v25 = vld [vmem:[%s3405_s2] ss:$0 sm:$0xff] }
   0x8   :  { %2166 = vmatmul.mubr.msk.f32.vlgmr.msra.gmra.mrb[0].mxu0 %vm70_vm0, %v46_v5  ;;  %2178 = vmatmul.mubr.msk.f32.vlgmr.msra.gmra.mrb[0].mxu1 %vm70_vm0, %v54_v6  ;;  %v60_v21 = vld [vmem:[%s3403_s0 + $0x78] sm:$0xff]  ;;  %v802_v10 = vld [vmem:[%s3406_s5] sm:$0xff] }
   0x9   :  { %2168 = vmatprep.mubr.msk.f32.mxu0 %vm70_vm0, %v47_v7  ;;  %2180 = vmatprep.mubr.msk.f32.mxu1 %vm70_vm0, %v55_v8  ;;  %v283_v23 = vld [vmem:[%s3404_s3 + $0x18] sm:$0xff] }
   0xa   :  { %2404 = vmatpush3.bf16.msra.mxu1 %v2401_v11  ;;  %v2405_v24 = vpack.c.bf16 %v283_v23, %v282_v22  ;;  %v803_v11 = vld [vmem:[%s3406_s5 + $0x8] sm:$0xff] }
   0xc   :  { %2169 = vmatmul.mubr.msk.f32.gmra.mrb[2].mxu0 %vm70_vm0, %v48_v12  ;;  %2181 = vmatmul.mubr.msk.f32.gmra.mrb[2].mxu1 %vm70_vm0, %v56_v13  ;;  %v605_v12 = vld [vmem:[%s3407_s4] sm:$0xff]  ;;  %v2417_v13 = vpack.c.bf16 %v803_v11, %v802_v10 }
   0xd   :  { %2171 = vmatprep.mubr.msk.f32.mxu0 %vm70_vm0, %v49_v14  ;;  %2183 = vmatprep.mubr.msk.f32.mxu1 %vm70_vm0, %v57_v15  ;;  %v606_v14 = vld [vmem:[%s3407_s4 + $0x8] sm:$0xff] }
   0xe   :  { %2406 = vmatprep.subr.bf16.mxu1 %v2405_v24  ;;  %v2409_v15 = vpack.c.bf16 %v606_v14, %v605_v12 }
   0xf   :  { %2408 = vmatpush3.bf16.msra.mxu1 %v2405_v24 }
  0x10   :  { %2172 = vmatmul.mubr.msk.f32.gmra.mrb[4].mxu0 %vm70_vm0, %v50_v16  ;;  %2184 = vmatmul.mubr.msk.f32.gmra.mrb[4].mxu1 %vm70_vm0, %v58_v17  ;;  %v804_v16 = vld [vmem:[%s3406_s5 + $0x10] sm:$0xff]  ;;  %v805_v17 = vld [vmem:[%s3406_s5 + $0x18] sm:$0xff] }
  0x11   :  { %2174 = vmatprep.mubr.msk.f32.mxu0 %vm70_vm0, %v51_v18  ;;  %2186 = vmatprep.mubr.msk.f32.mxu1 %vm70_vm0, %v59_v19  ;;  %v607_v18 = vld [vmem:[%s3407_s4 + $0x10] sm:$0xff]  ;;  %v2421_v19 = vpack.c.bf16 %v805_v17, %v804_v16 }
  0x12   :  { %2418 = vmatprep.subr.bf16.mxu1 %v2417_v13  ;;  %2410 = vmatprep.subr.bf16.mxu0 %v2409_v15 }
  0x13   :  { %2412 = vmatpush3.bf16.msra.mxu0 %v2409_v15 }
  0x14   :  { %2175 = vmatmul.mubr.msk.f32.gmra.mrb[6].mxu0 %vm70_vm0, %v52_v20  ;;  %2187 = vmatmul.mubr.msk.f32.gmra.mrb[6].mxu1 %vm70_vm0, %v60_v21  ;;  %v608_v20 = vld [vmem:[%s3407_s4 + $0x18] sm:$0xff] }
  0x15   :  { %v2413_v21 = vpack.c.bf16 %v608_v20, %v607_v18 }
  0x17   :  { %2414 = vmatprep.subr.bf16.mxu0 %v2413_v21 }
  0x18   :  { %2416 = vmatpush3.bf16.msra.mxu0 %v2413_v21 }
  0xdb   :  { %v2167_v26 = vpop.f32.mrb[0].mxu0  ;;  %v2179_v27 = vpop.f32.mrb[0].mxu1 }
  0xdc   :  { %v191_v28 = vadd.f32 %v2167_v26, %v2754_v25  ;;  %v185_v29 = vpop.f32.mrb[1].mxu0  ;;  %v225_v30 = vpop.f32.mrb[1].mxu1  ;;  %v231_v54 = vadd.f32 %v2179_v27, %v2754_v25 }
  0xdd   :  { %v186_v31 = vadd.f32 %v2754_v25, %v185_v29  ;;  %v226_v44 = vadd.f32 %v2754_v25, %v225_v30 }
  0xdf   :  { %2467 = vtanh.f32 %v186_v31  ;;  %v2170_v32 = vpop.f32.mrb[2].mxu0  ;;  %v2182_v33 = vpop.f32.mrb[2].mxu1 }
  0xe0   :  { %2469 = vtanh.f32 %v191_v28  ;;  %v201_v34 = vadd.f32 %v2170_v32, %v2754_v25  ;;  %v195_v35 = vpop.f32.mrb[3].mxu0  ;;  %v235_v36 = vpop.f32.mrb[3].mxu1  ;;  %v241_v58 = vadd.f32 %v2182_v33, %v2754_v25 }
  0xe1   :  { %v196_v37 = vadd.f32 %v2754_v25, %v195_v35  ;;  %v236_v53 = vadd.f32 %v2754_v25, %v235_v36 }
  0xe3   :  { %2471 = vtanh.f32 %v196_v37  ;;  %v2173_v38 = vpop.f32.mrb[4].mxu0  ;;  %v2185_v39 = vpop.f32.mrb[4].mxu1 }
  0xe4   :  { %2473 = vtanh.f32 %v201_v34  ;;  %v211_v40 = vadd.f32 %v2173_v38, %v2754_v25  ;;  %v205_v41 = vpop.f32.mrb[5].mxu0  ;;  %v245_v42 = vpop.f32.mrb[5].mxu1  ;;  %v251_v63 = vadd.f32 %v2185_v39, %v2754_v25 }
  0xe5   :  { %v206_v43 = vadd.f32 %v2754_v25, %v205_v41  ;;  %v246_v57 = vadd.f32 %v2754_v25, %v245_v42 }
  0xe7   :  { %2475 = vtanh.f32 %v206_v43  ;;  %v2176_v45 = vpop.f32.mrb[6].mxu0  ;;  %v2188_v46 = vpop.f32.mrb[6].mxu1 }
  0xe8   :  { %2477 = vtanh.f32 %v211_v40  ;;  %v221_v47 = vadd.f32 %v2176_v45, %v2754_v25  ;;  %v215_v48 = vpop.f32.mrb[7].mxu0  ;;  %v255_v49 = vpop.f32.mrb[7].mxu1  ;;  %v261_v2 = vadd.f32 %v2188_v46, %v2754_v25 }
  0xe9   :  { %v2468_v50 = vpop.eup %2467  ;;  %v216_v51 = vadd.f32 %v2754_v25, %v215_v48  ;;  %2479 = vtanh.f32 %v226_v44  ;;  %v256_v61 = vadd.f32 %v2754_v25, %v255_v49  ;;  %v967_v49 = vld [vmem:[%s3408_s6] sm:$0xff] }
  0xea   :  { %v2470_v52 = vpop.eup %2469  ;;  %2197 = vmatprep.mubr.msk.f32.mxu1 %vm284_vm1, %v2468_v50  ;;  %v968_v50 = vld [vmem:[%s3408_s6 + $0x8] sm:$0xff] }
  0xeb   :  { %2481 = vtanh.f32 %v216_v51  ;;  %2198 = vmatmul.mubr.msk.f32.vlgmr.msra.gmra.mrb[8].mxu1 %vm284_vm1, %v2470_v52 }
  0xec   :  { %2483 = vtanh.f32 %v221_v47  ;;  %2420 = vmatpush3.bf16.msra.mxu1 %v2417_v13 }
  0xed   :  { %v2472_v55 = vpop.eup %2471  ;;  %2485 = vtanh.f32 %v236_v53  ;;  %2422 = vmatprep.subr.bf16.mxu1 %v2421_v19  ;;  %v2828_v53 = vpack.c.bf16 %v968_v50, %v967_v49 }
  0xee   :  { %v2474_v56 = vpop.eup %2473  ;;  %2200 = vmatprep.mubr.msk.f32.mxu1 %vm284_vm1, %v2472_v55  ;;  %2487 = vtanh.f32 %v231_v54 }
  0xef   :  { %2201 = vmatmul.mubr.msk.f32.gmra.mrb[10].mxu1 %vm284_vm1, %v2474_v56  ;;  %2489 = vtanh.f32 %v246_v57  ;;  %2426 = vmatprep.subr.bf16.mxu0 %v2828_v53 }
  0xf0   :  { %2491 = vtanh.f32 %v241_v58  ;;  %2424 = vmatpush3.bf16.msra.mxu1 %v2421_v19 }
  0xf1   :  { %v2476_v59 = vpop.eup %2475  ;;  %2493 = vtanh.f32 %v256_v61 }
  0xf2   :  { %v2478_v60 = vpop.eup %2477  ;;  %2203 = vmatprep.mubr.msk.f32.mxu1 %vm284_vm1, %v2476_v59  ;;  %2495 = vtanh.f32 %v251_v63 }
  0xf3   :  { %2204 = vmatmul.mubr.msk.f32.gmra.mrb[12].mxu1 %vm284_vm1, %v2478_v60  ;;  %v2480_v62 = vpop.eup %2479  ;;  %2497 = vtanh.f32 %v261_v2 }
  0xf5   :  { %v2482_v0 = vpop.eup %2481 }
  0xf6   :  { %v2484_v1 = vpop.eup %2483  ;;  %2206 = vmatprep.mubr.msk.f32.mxu1 %vm284_vm1, %v2482_v0 }
  0xf7   :  { %2207 = vmatmul.mubr.msk.f32.gmra.mrb[14].mxu1 %vm284_vm1, %v2484_v1  ;;  %v2486_v3 = vpop.eup %2485 }
  0xf8   :  { %2209 = vmatprep.mubr.msk.f32.mxu1 %vm284_vm1, %v2480_v62  ;;  %v2488_v4 = vpop.eup %2487 }
  0xf9   :  { %v2490_v5 = vpop.eup %2489 }
  0xfa   :  { %v2492_v6 = vpop.eup %2491 }
  0xfb   :  { %2210 = vmatmul.mubr.msk.f32.gmra.mrb[16].mxu1 %vm284_vm1, %v2488_v4  ;;  %v2494_v7 = vpop.eup %2493 }
  0xfc   :  { %2212 = vmatprep.mubr.msk.f32.mxu1 %vm284_vm1, %v2486_v3  ;;  %v2496_v8 = vpop.eup %2495 }
  0xfd   :  { %v2498_v9 = vpop.eup %2497 }
  0xff   :  { %2213 = vmatmul.mubr.msk.f32.gmra.mrb[18].mxu1 %vm284_vm1, %v2492_v6 }
 0x100   :  { %2215 = vmatprep.mubr.msk.f32.mxu1 %vm284_vm1, %v2490_v5 }
 0x103   :  { %2216 = vmatmul.mubr.msk.f32.gmra.mrb[20].mxu1 %vm284_vm1, %v2496_v8 }
 0x104   :  { %2218 = vmatprep.mubr.msk.f32.mxu1 %vm284_vm1, %v2494_v7 }
 0x107   :  { %2219 = vmatmul.mubr.msk.f32.gmra.mrb[22].mxu1 %vm284_vm1, %v2498_v9 }
 0x1be   :  { %v2199_v22 = vpop.f32.mrb[8].mxu1 }
 0x1bf   :  { %v479_v23 = vsel %vm284_vm1, %v2199_v22, 0.0  ;;  %v399_v24 = vpop.f32.mrb[9].mxu1 }
 0x1c0   :  { %v478_v25 = vsel %vm284_vm1, %v399_v24, 0.0 }
 0x1c1   :  { %v480_v26 = vadd.f32 %v479_v23, %v478_v25 }
 0x1c2   :  { %v2202_v27 = vpop.f32.mrb[10].mxu1 }
 0x1c3   :  { %v409_v28 = vpop.f32.mrb[11].mxu1  ;;  %v483_v31 = vsel %vm284_vm1, %v2202_v27, 0.0 }
 0x1c4   :  { %v481_v29 = vsel %vm284_vm1, %v409_v28, 0.0 }
 0x1c5   :  { %v482_v30 = vadd.f32 %v481_v29, %v480_v26 }
 0x1c6   :  { %v2205_v32 = vpop.f32.mrb[12].mxu1 }
 0x1c7   :  { %v419_v33 = vpop.f32.mrb[13].mxu1  ;;  %v484_v34 = vadd.f32 %v483_v31, %v482_v30  ;;  %v487_v37 = vsel %vm284_vm1, %v2205_v32, 0.0 }
 0x1c8   :  { %v485_v35 = vsel %vm284_vm1, %v419_v33, 0.0 }
 0x1c9   :  { %v486_v36 = vadd.f32 %v485_v35, %v484_v34 }
 0x1ca   :  { %v2208_v38 = vpop.f32.mrb[14].mxu1 }
 0x1cb   :  { %v429_v39 = vpop.f32.mrb[15].mxu1  ;;  %v488_v40 = vadd.f32 %v487_v37, %v486_v36  ;;  %v491_v43 = vsel %vm284_vm1, %v2208_v38, 0.0 }
 0x1cc   :  { %v489_v41 = vsel %vm284_vm1, %v429_v39, 0.0 }
 0x1cd   :  { %v490_v42 = vadd.f32 %v489_v41, %v488_v40 }
 0x1ce   :  { %v2211_v44 = vpop.f32.mrb[16].mxu1 }
 0x1cf   :  { %v439_v45 = vpop.f32.mrb[17].mxu1  ;;  %v492_v46 = vadd.f32 %v491_v43, %v490_v42  ;;  %v495_v51 = vsel %vm284_vm1, %v2211_v44, 0.0 }
 0x1d0   :  { %v493_v47 = vsel %vm284_vm1, %v439_v45, 0.0 }
 0x1d1   :  { %v494_v48 = vadd.f32 %v493_v47, %v492_v46 }
 0x1d2   :  { %v2214_v52 = vpop.f32.mrb[18].mxu1 }
 0x1d3   :  { %v449_v54 = vpop.f32.mrb[19].mxu1  ;;  %v496_v55 = vadd.f32 %v495_v51, %v494_v48  ;;  %v499_v58 = vsel %vm284_vm1, %v2214_v52, 0.0 }
 0x1d4   :  { %v497_v56 = vsel %vm284_vm1, %v449_v54, 0.0 }
 0x1d5   :  { %v498_v57 = vadd.f32 %v497_v56, %v496_v55 }
 0x1d6   :  { %v2217_v59 = vpop.f32.mrb[20].mxu1 }
 0x1d7   :  { %v459_v60 = vpop.f32.mrb[21].mxu1  ;;  %v500_v61 = vadd.f32 %v499_v58, %v498_v57  ;;  %v503_v0 = vsel %vm284_vm1, %v2217_v59, 0.0 }
 0x1d8   :  { %v501_v62 = vsel %vm284_vm1, %v459_v60, 0.0 }
 0x1d9   :  { %v502_v63 = vadd.f32 %v501_v62, %v500_v61 }
 0x1da   :  { %v2220_v1 = vpop.f32.mrb[22].mxu1 }
 0x1db   :  { %v469_v2 = vpop.f32.mrb[23].mxu1  ;;  %v504_v3 = vadd.f32 %v503_v0, %v502_v63  ;;  %v507_v6 = vsel %vm284_vm1, %v2220_v1, 0.0 }
 0x1dc   :  { %v505_v4 = vsel %vm284_vm1, %v469_v2, 0.0 }
 0x1dd   :  { %v506_v5 = vadd.f32 %v505_v4, %v504_v3 }
 0x1df   :  { %v508_v7 = vadd.f32 %v507_v6, %v506_v5 }
 0x1e1   :  { %v509_v8 = vrot.slane %v508_v7, 4 }
 0x1e3   :  { %v510_v9 = vadd.f32 %v509_v8, %v508_v7 }
 0x1e5   :  { %v511_v10 = vrot.slane %v510_v9, 2 }
 0x1e7   :  { %v512_v11 = vadd.f32 %v511_v10, %v510_v9 }
 0x1e9   :  { %v513_v12 = vrot.slane %v512_v11, 1 }
 0x1eb   :  { %v514_v13 = vadd.f32 %v513_v12, %v512_v11 }
 0x1ed   :  { %v516_v14 = vmul.f32 0.0078125, %v514_v13 }
 0x1ef   :  { %v2837_v15 = vsub.f32 %v399_v24, %v516_v14  ;;  %v2839_v16 = vsub.f32 %v2199_v22, %v516_v14  ;;  %v2841_v17 = vsub.f32 %v409_v28, %v516_v14  ;;  %v2843_v18 = vsub.f32 %v2202_v27, %v516_v14 }
 0x1f0   :  { %v2845_v19 = vsub.f32 %v419_v33, %v516_v14  ;;  %v2847_v20 = vsub.f32 %v2205_v32, %v516_v14  ;;  %v2849_v21 = vsub.f32 %v429_v39, %v516_v14  ;;  %v2851_v23 = vsub.f32 %v2208_v38, %v516_v14 }
 0x1f1   :  { %v2853_v25 = vsub.f32 %v439_v45, %v516_v14  ;;  %v2855_v26 = vsub.f32 %v2211_v44, %v516_v14  ;;  %v2857_v24 = vsub.f32 %v449_v54, %v516_v14  ;;  %v2859_v22 = vsub.f32 %v2214_v52, %v516_v14 }
 0x1f2   :  { %v2861_v28 = vsub.f32 %v459_v60, %v516_v14  ;;  %v2863_v27 = vsub.f32 %v2217_v59, %v516_v14  ;;  %v531_v29 = vsub.f32 %v469_v2, %v516_v14  ;;  %v2865_v30 = vsub.f32 %v2220_v1, %v516_v14 }
 0x1f3   :  { %v533_v31 = vmul.f32 %v2837_v15, %v2837_v15  ;;  %v534_v32 = vmul.f32 %v2839_v16, %v2839_v16  ;;  %v535_v33 = vmul.f32 %v2841_v17, %v2841_v17  ;;  %v536_v34 = vmul.f32 %v2843_v18, %v2843_v18 }
 0x1f4   :  { %v537_v38 = vmul.f32 %v2845_v19, %v2845_v19  ;;  %v538_v41 = vmul.f32 %v2847_v20, %v2847_v20  ;;  %v539_v44 = vmul.f32 %v2849_v21, %v2849_v21  ;;  %v540_v47 = vmul.f32 %v2851_v23, %v2851_v23 }
 0x1f5   :  { %v549_v35 = vsel %vm284_vm1, %v533_v31, 0.0  ;;  %v550_v36 = vsel %vm284_vm1, %v534_v32, 0.0  ;;  %v552_v39 = vsel %vm284_vm1, %v535_v33, 0.0  ;;  %v554_v42 = vsel %vm284_vm1, %v536_v34, 0.0 }
 0x1f6   :  { %v551_v37 = vadd.f32 %v550_v36, %v549_v35  ;;  %v556_v45 = vsel %vm284_vm1, %v537_v38, 0.0  ;;  %v558_v48 = vsel %vm284_vm1, %v538_v41, 0.0  ;;  %v541_v50 = vmul.f32 %v2853_v25, %v2853_v25 }
 0x1f7   :  { %v560_v51 = vsel %vm284_vm1, %v539_v44, 0.0  ;;  %v542_v54 = vmul.f32 %v2855_v26, %v2855_v26  ;;  %v562_v55 = vsel %vm284_vm1, %v540_v47, 0.0  ;;  %v543_v57 = vmul.f32 %v2857_v24, %v2857_v24 }
 0x1f8   :  { %v553_v40 = vadd.f32 %v552_v39, %v551_v37  ;;  %v564_v58 = vsel %vm284_vm1, %v541_v50, 0.0  ;;  %v544_v60 = vmul.f32 %v2859_v22, %v2859_v22  ;;  %v545_v63 = vmul.f32 %v2861_v28, %v2861_v28  ;;  %v969_v39 = vld [vmem:[%s3408_s6 + $0x10] sm:$0xff] }
 0x1f9   :  { %v566_v61 = vsel %vm284_vm1, %v542_v54, 0.0  ;;  %v568_v0 = vsel %vm284_vm1, %v543_v57, 0.0  ;;  %v546_v2 = vmul.f32 %v2863_v27, %v2863_v27  ;;  %v547_v5 = vmul.f32 %v531_v29, %v531_v29 }
 0x1fa   :  { %v555_v43 = vadd.f32 %v554_v42, %v553_v40  ;;  %v570_v3 = vsel %vm284_vm1, %v544_v60, 0.0  ;;  %v572_v6 = vsel %vm284_vm1, %v545_v63, 0.0  ;;  %v548_v8 = vmul.f32 %v2865_v30, %v2865_v30  ;;  %v970_v40 = vld [vmem:[%s3408_s6 + $0x18] sm:$0xff] }
 0x1fb   :  { %v574_v9 = vsel %vm284_vm1, %v546_v2, 0.0  ;;  %v576_v11 = vsel %vm284_vm1, %v547_v5, 0.0  ;;  %v2429_v42 = vpack.c.bf16 %v970_v40, %v969_v39 }
 0x1fc   :  { %v557_v46 = vadd.f32 %v556_v45, %v555_v43  ;;  %v578_v13 = vsel %vm284_vm1, %v548_v8, 0.0 }
 0x1fe   :  { %v559_v49 = vadd.f32 %v558_v48, %v557_v46 }
 0x200   :  { %v561_v52 = vadd.f32 %v560_v51, %v559_v49  ;;  %v977_v51 = vld [vmem:[%s3408_s6 + $0x50] sm:$0xff] }
 0x202   :  { %v563_v56 = vadd.f32 %v562_v55, %v561_v52  ;;  %v978_v52 = vld [vmem:[%s3408_s6 + $0x58] sm:$0xff] }
 0x203   :  { %v2445_v54 = vpack.c.bf16 %v978_v52, %v977_v51 }
 0x204   :  { %v565_v59 = vadd.f32 %v564_v58, %v563_v56 }
 0x206   :  { %v567_v62 = vadd.f32 %v566_v61, %v565_v59 }
 0x208   :  { %v569_v1 = vadd.f32 %v568_v0, %v567_v62 }
 0x20a   :  { %v571_v4 = vadd.f32 %v570_v3, %v569_v1 }
 0x20c   :  { %v573_v7 = vadd.f32 %v572_v6, %v571_v4 }
 0x20e   :  { %v575_v10 = vadd.f32 %v574_v9, %v573_v7 }
 0x210   :  { %v577_v12 = vadd.f32 %v576_v11, %v575_v10 }
 0x212   :  { %v579_v14 = vadd.f32 %v578_v13, %v577_v12 }
 0x214   :  { %v580_v31 = vrot.slane %v579_v14, 4 }
 0x216   :  { %v581_v32 = vadd.f32 %v580_v31, %v579_v14 }
 0x218   :  { %v582_v33 = vrot.slane %v581_v32, 2 }
 0x21a   :  { %v583_v34 = vadd.f32 %v582_v33, %v581_v32 }
 0x21c   :  { %v584_v35 = vrot.slane %v583_v34, 1 }
 0x21e   :  { %v585_v36 = vadd.f32 %v584_v35, %v583_v34 }
 0x220   :  { %v586_v37 = vmul.f32 0.0078125, %v585_v36 }
 0x222   :  { %v587_v38 = vadd.f32 1e-05, %v586_v37 }
 0x224   :  { %2499 = vrsqrt.f32 %v587_v38 }
 0x22e   :  { %v2500_v41 = vpop.eup %2499 }
 0x22f   :  { %v2919_v43 = vmul.f32 %v2500_v41, %v531_v29  ;;  %v589_v44 = vmul.f32 %v2500_v41, %v2837_v15  ;;  %v590_v45 = vmul.f32 %v2500_v41, %v2839_v16  ;;  %v591_v46 = vmul.f32 %v2500_v41, %v2841_v17 }
 0x230   :  { %v592_v47 = vmul.f32 %v2500_v41, %v2843_v18  ;;  %v593_v48 = vmul.f32 %v2500_v41, %v2845_v19  ;;  %v594_v49 = vmul.f32 %v2500_v41, %v2847_v20  ;;  %v595_v50 = vmul.f32 %v2500_v41, %v2849_v21  ;;  %v971_v20 = vld [vmem:[%s3408_s6 + $0x20] sm:$0xff]  ;;  %v972_v21 = vld [vmem:[%s3408_s6 + $0x28] sm:$0xff] }
 0x231   :  { %2229 = vmatprep.mubr.msk.f32.mxu0 %vm284_vm1, %v589_v44  ;;  %2261 = vmatprep.mubr.msk.f32.mxu1 %vm284_vm1, %v589_v44  ;;  %v596_v29 = vmul.f32 %v2500_v41, %v2851_v23  ;;  %v597_v15 = vmul.f32 %v2500_v41, %v2853_v25  ;;  %v598_v16 = vmul.f32 %v2500_v41, %v2855_v26 }
 0x232   :  { %2230 = vmatmul.mubr.msk.f32.vlgmr.msra.gmra.mrb[8].mxu0 %vm284_vm1, %v590_v45  ;;  %2262 = vmatmul.mubr.msk.f32.vlgmr.msra.gmra.mrb[24].mxu1 %vm284_vm1, %v590_v45  ;;  %v599_v17 = vmul.f32 %v2500_v41, %v2857_v24  ;;  %v600_v18 = vmul.f32 %v2500_v41, %v2859_v22  ;;  %v601_v19 = vmul.f32 %v2500_v41, %v2861_v28  ;;  %v973_v24 = vld [vmem:[%s3408_s6 + $0x30] sm:$0xff]  ;;  %v974_v22 = vld [vmem:[%s3408_s6 + $0x38] sm:$0xff]  ;;  %v975_v28 = vld [vmem:[%s3408_s6 + $0x40] sm:$0xff] }
 0x233   :  { %2232 = vmatprep.mubr.msk.f32.mxu0 %vm284_vm1, %v591_v46  ;;  %2264 = vmatprep.mubr.msk.f32.mxu1 %vm284_vm1, %v591_v46  ;;  %v602_v23 = vmul.f32 %v2500_v41, %v2863_v27  ;;  %v604_v25 = vmul.f32 %v2500_v41, %v2865_v30  ;;  %v2433_v26 = vpack.c.bf16 %v972_v21, %v971_v20  ;;  %v976_v27 = vld [vmem:[%s3408_s6 + $0x48] sm:$0xff] }
 0x234   :  { %2428 = vmatpush3.bf16.msra.mxu0 %v2828_v53  ;;  %v2437_v53 = vpack.c.bf16 %v974_v22, %v973_v24  ;;  %v2441_v30 = vpack.c.bf16 %v976_v27, %v975_v28 }
 0x235   :  { %2430 = vmatprep.subr.bf16.mxu0 %v2429_v42 }
 0x236   :  { %2233 = vmatmul.mubr.msk.f32.gmra.mrb[10].mxu0 %vm284_vm1, %v592_v47  ;;  %2265 = vmatmul.mubr.msk.f32.gmra.mrb[26].mxu1 %vm284_vm1, %v592_v47 }
 0x237   :  { %2235 = vmatprep.mubr.msk.f32.mxu0 %vm284_vm1, %v593_v48  ;;  %2267 = vmatprep.mubr.msk.f32.mxu1 %vm284_vm1, %v593_v48 }
 0x238   :  { %2432 = vmatpush3.bf16.msra.mxu0 %v2429_v42 }
 0x239   :  { %2434 = vmatprep.subr.bf16.mxu0 %v2433_v26 }
 0x23a   :  { %2236 = vmatmul.mubr.msk.f32.gmra.mrb[12].mxu0 %vm284_vm1, %v594_v49  ;;  %2268 = vmatmul.mubr.msk.f32.gmra.mrb[28].mxu1 %vm284_vm1, %v594_v49 }
 0x23b   :  { %2238 = vmatprep.mubr.msk.f32.mxu0 %vm284_vm1, %v595_v50  ;;  %2270 = vmatprep.mubr.msk.f32.mxu1 %vm284_vm1, %v595_v50 }
 0x23c   :  { %2436 = vmatpush3.bf16.msra.mxu0 %v2433_v26 }
 0x23d   :  { %2438 = vmatprep.subr.bf16.mxu0 %v2437_v53 }
 0x23e   :  { %2239 = vmatmul.mubr.msk.f32.gmra.mrb[14].mxu0 %vm284_vm1, %v596_v29  ;;  %2271 = vmatmul.mubr.msk.f32.gmra.mrb[30].mxu1 %vm284_vm1, %v596_v29 }
 0x23f   :  { %2241 = vmatprep.mubr.msk.f32.mxu0 %vm284_vm1, %v597_v15  ;;  %2273 = vmatprep.mubr.msk.f32.mxu1 %vm284_vm1, %v597_v15 }
 0x240   :  { %2440 = vmatpush3.bf16.msra.mxu0 %v2437_v53 }
 0x241   :  { %2442 = vmatprep.subr.bf16.mxu0 %v2441_v30 }
 0x242   :  { %2242 = vmatmul.mubr.msk.f32.gmra.mrb[16].mxu0 %vm284_vm1, %v598_v16  ;;  %2274 = vmatmul.mubr.msk.f32.gmra.mrb[32].mxu1 %vm284_vm1, %v598_v16 }
 0x243   :  { %2244 = vmatprep.mubr.msk.f32.mxu0 %vm284_vm1, %v599_v17  ;;  %2276 = vmatprep.mubr.msk.f32.mxu1 %vm284_vm1, %v599_v17 }
 0x244   :  { %2444 = vmatpush3.bf16.msra.mxu0 %v2441_v30 }
 0x245   :  { %2446 = vmatprep.subr.bf16.mxu0 %v2445_v54 }
 0x246   :  { %2245 = vmatmul.mubr.msk.f32.gmra.mrb[18].mxu0 %vm284_vm1, %v600_v18  ;;  %2277 = vmatmul.mubr.msk.f32.gmra.mrb[34].mxu1 %vm284_vm1, %v600_v18  ;;  %v3014_v18 = vld [vmem:[%s3409_s7] ss:$0 sm:$0xff] }
 0x247   :  { %2247 = vmatprep.mubr.msk.f32.mxu0 %vm284_vm1, %v601_v19  ;;  %2279 = vmatprep.mubr.msk.f32.mxu1 %vm284_vm1, %v601_v19 }
 0x248   :  { %2448 = vmatpush3.bf16.msra.mxu0 %v2445_v54 }
 0x24a   :  { %2248 = vmatmul.mubr.msk.f32.gmra.mrb[20].mxu0 %vm284_vm1, %v602_v23  ;;  %2280 = vmatmul.mubr.msk.f32.gmra.mrb[36].mxu1 %vm284_vm1, %v602_v23 }
 0x24b   :  { %2250 = vmatprep.mubr.msk.f32.mxu0 %vm284_vm1, %v2919_v43  ;;  %2282 = vmatprep.mubr.msk.f32.mxu1 %vm284_vm1, %v2919_v43 }
 0x24e   :  { %2251 = vmatmul.mubr.msk.f32.gmra.mrb[22].mxu0 %vm284_vm1, %v604_v25  ;;  %2283 = vmatmul.mubr.msk.f32.gmra.mrb[38].mxu1 %vm284_vm1, %v604_v25 }
 0x305   :  { %v2231_v55 = vpop.f32.mrb[8].mxu0  ;;  %v2263_v56 = vpop.f32.mrb[24].mxu1 }
 0x306   :  { %v952_v57 = vmax.f32 %v2231_v55, %v2263_v56  ;;  %v723_v58 = vpop.f32.mrb[9].mxu0  ;;  %v872_v59 = vpop.f32.mrb[25].mxu1  ;;  %v1322_v55 = vld [vmem:[%s3410_s8] sm:$0xff]  ;;  %v1323_v56 = vld [vmem:[%s3410_s8 + $0x8] sm:$0xff] }
 0x307   :  { %v951_v60 = vmax.f32 %v723_v58, %v872_v59 }
 0x309   :  { %v2234_v61 = vpop.f32.mrb[10].mxu0  ;;  %v2266_v62 = vpop.f32.mrb[26].mxu1  ;;  %2309 = vmatprep.mubr.msk.f32.mxu0 %vm986_vm2, %v951_v60 }
 0x30a   :  { %v954_v63 = vmax.f32 %v2234_v61, %v2266_v62  ;;  %v733_v0 = vpop.f32.mrb[11].mxu0  ;;  %v882_v1 = vpop.f32.mrb[27].mxu1  ;;  %2310 = vmatmul.mubr.msk.f32.vlgmr.msra.gmra.mrb[24].mxu0 %vm986_vm2, %v952_v57  ;;  %v1324_v57 = vld [vmem:[%s3410_s8 + $0x10] sm:$0xff]  ;;  %v2449_v61 = vpack.c.bf16 %v1323_v56, %v1322_v55  ;;  %v1325_v62 = vld [vmem:[%s3410_s8 + $0x18] sm:$0xff] }
 0x30b   :  { %v953_v2 = vmax.f32 %v733_v0, %v882_v1  ;;  %v2453_v0 = vpack.c.bf16 %v1325_v62, %v1324_v57 }
 0x30c   :  { %2450 = vmatprep.subr.bf16.mxu1 %v2449_v61 }
 0x30d   :  { %v2237_v3 = vpop.f32.mrb[12].mxu0  ;;  %v2269_v4 = vpop.f32.mrb[28].mxu1  ;;  %2312 = vmatprep.mubr.msk.f32.mxu0 %vm986_vm2, %v953_v2  ;;  %2452 = vmatpush3.bf16.msra.mxu1 %v2449_v61 }
 0x30e   :  { %v956_v5 = vmax.f32 %v2237_v3, %v2269_v4  ;;  %v743_v6 = vpop.f32.mrb[13].mxu0  ;;  %v892_v7 = vpop.f32.mrb[29].mxu1  ;;  %2313 = vmatmul.mubr.msk.f32.gmra.mrb[26].mxu0 %vm986_vm2, %v954_v63  ;;  %2454 = vmatprep.subr.bf16.mxu1 %v2453_v0 }
 0x30f   :  { %v955_v8 = vmax.f32 %v743_v6, %v892_v7 }
 0x311   :  { %v2240_v9 = vpop.f32.mrb[14].mxu0  ;;  %v2272_v10 = vpop.f32.mrb[30].mxu1  ;;  %2315 = vmatprep.mubr.msk.f32.mxu0 %vm986_vm2, %v955_v8  ;;  %2456 = vmatpush3.bf16.msra.mxu1 %v2453_v0 }
 0x312   :  { %v958_v11 = vmax.f32 %v2240_v9, %v2272_v10  ;;  %v753_v12 = vpop.f32.mrb[15].mxu0  ;;  %v902_v13 = vpop.f32.mrb[31].mxu1  ;;  %2316 = vmatmul.mubr.msk.f32.gmra.mrb[28].mxu0 %vm986_vm2, %v956_v5 }
 0x313   :  { %v957_v14 = vmax.f32 %v753_v12, %v902_v13 }
 0x315   :  { %v2243_v31 = vpop.f32.mrb[16].mxu0  ;;  %v2275_v32 = vpop.f32.mrb[32].mxu1  ;;  %2318 = vmatprep.mubr.msk.f32.mxu0 %vm986_vm2, %v957_v14 }
 0x316   :  { %v960_v33 = vmax.f32 %v2243_v31, %v2275_v32  ;;  %v763_v34 = vpop.f32.mrb[17].mxu0  ;;  %v912_v35 = vpop.f32.mrb[33].mxu1  ;;  %2319 = vmatmul.mubr.msk.f32.gmra.mrb[30].mxu0 %vm986_vm2, %v958_v11 }
 0x317   :  { %v959_v36 = vmax.f32 %v763_v34, %v912_v35 }
 0x319   :  { %v2246_v37 = vpop.f32.mrb[18].mxu0  ;;  %v2278_v38 = vpop.f32.mrb[34].mxu1  ;;  %2321 = vmatprep.mubr.msk.f32.mxu0 %vm986_vm2, %v959_v36 }
 0x31a   :  { %v962_v39 = vmax.f32 %v2246_v37, %v2278_v38  ;;  %v773_v40 = vpop.f32.mrb[19].mxu0  ;;  %v922_v41 = vpop.f32.mrb[35].mxu1  ;;  %2322 = vmatmul.mubr.msk.f32.gmra.mrb[32].mxu0 %vm986_vm2, %v960_v33 }
 0x31b   :  { %v961_v42 = vmax.f32 %v773_v40, %v922_v41 }
 0x31d   :  { %v2249_v43 = vpop.f32.mrb[20].mxu0  ;;  %v2281_v44 = vpop.f32.mrb[36].mxu1  ;;  %2324 = vmatprep.mubr.msk.f32.mxu0 %vm986_vm2, %v961_v42 }
 0x31e   :  { %v964_v45 = vmax.f32 %v2249_v43, %v2281_v44  ;;  %v783_v46 = vpop.f32.mrb[21].mxu0  ;;  %v932_v47 = vpop.f32.mrb[37].mxu1  ;;  %2325 = vmatmul.mubr.msk.f32.gmra.mrb[34].mxu0 %vm986_vm2, %v962_v39 }
 0x31f   :  { %v963_v48 = vmax.f32 %v783_v46, %v932_v47 }
 0x321   :  { %v2252_v49 = vpop.f32.mrb[22].mxu0  ;;  %v2284_v50 = vpop.f32.mrb[38].mxu1  ;;  %2327 = vmatprep.mubr.msk.f32.mxu0 %vm986_vm2, %v963_v48 }
 0x322   :  { %v966_v29 = vmax.f32 %v2252_v49, %v2284_v50  ;;  %v793_v15 = vpop.f32.mrb[23].mxu0  ;;  %v942_v16 = vpop.f32.mrb[39].mxu1  ;;  %2328 = vmatmul.mubr.msk.f32.gmra.mrb[36].mxu0 %vm986_vm2, %v964_v45 }
 0x323   :  { %v965_v17 = vmax.f32 %v793_v15, %v942_v16 }
 0x325   :  { %2330 = vmatprep.mubr.msk.f32.mxu0 %vm986_vm2, %v965_v17 }
 0x326   :  { %2331 = vmatmul.mubr.msk.f32.gmra.mrb[38].mxu0 %vm986_vm2, %v966_v29 }
 0x3dd   :  { %v2311_v19 = vpop.f32.mrb[24].mxu0 }
 0x3de   :  { %v3017_v20 = vadd.f32 %v2311_v19, %v3014_v18  ;;  %v1101_v21 = vpop.f32.mrb[25].mxu0 }
 0x3df   :  { %v3020_v23 = vadd.f32 %v3014_v18, %v1101_v21 }
 0x3e0   :  { %v1181_v25 = vsel %vm284_vm1, %v3017_v20, 0.0 }
 0x3e1   :  { %v1180_v26 = vsel %vm284_vm1, %v3020_v23, 0.0  ;;  %v2314_v24 = vpop.f32.mrb[26].mxu0 }
 0x3e2   :  { %v1182_v22 = vadd.f32 %v1181_v25, %v1180_v26  ;;  %v1111_v53 = vpop.f32.mrb[27].mxu0  ;;  %v3027_v28 = vadd.f32 %v2314_v24, %v3014_v18 }
 0x3e3   :  { %v3030_v27 = vadd.f32 %v3014_v18, %v1111_v53  ;;  %v1543_v53 = vld [vmem:[%s3411_s10 + $0x8] sm:$0xff] }
 0x3e4   :  { %v1185_v58 = vsel %vm284_vm1, %v3027_v28, 0.0 }
 0x3e5   :  { %v1183_v30 = vsel %vm284_vm1, %v3030_v27, 0.0  ;;  %v2317_v51 = vpop.f32.mrb[28].mxu0 }
 0x3e6   :  { %v1184_v52 = vadd.f32 %v1183_v30, %v1182_v22  ;;  %v1121_v54 = vpop.f32.mrb[29].mxu0  ;;  %v3046_v59 = vadd.f32 %v2317_v51, %v3014_v18  ;;  %v1542_v22 = vld [vmem:[%s3411_s10] sm:$0xff]  ;;  %v1544_v30 = vld [vmem:[%s3411_s10 + $0x10] sm:$0xff] }
 0x3e7   :  { %v3049_v60 = vadd.f32 %v3014_v18, %v1121_v54 }
 0x3e8   :  { %v1186_v63 = vadd.f32 %v1185_v58, %v1184_v52  ;;  %v1189_v5 = vsel %vm284_vm1, %v3046_v59, 0.0  ;;  %v1545_v52 = vld [vmem:[%s3411_s10 + $0x18] sm:$0xff] }
 0x3e9   :  { %v1187_v1 = vsel %vm284_vm1, %v3049_v60, 0.0  ;;  %v2320_v2 = vpop.f32.mrb[30].mxu0  ;;  %v2461_v54 = vpack.c.bf16 %v1545_v52, %v1544_v30 }
 0x3ea   :  { %v1188_v3 = vadd.f32 %v1187_v1, %v1186_v63  ;;  %v1131_v4 = vpop.f32.mrb[31].mxu0  ;;  %v3059_v6 = vadd.f32 %v2320_v2, %v3014_v18 }
 0x3eb   :  { %v3062_v7 = vadd.f32 %v3014_v18, %v1131_v4 }
 0x3ec   :  { %v1190_v8 = vadd.f32 %v1189_v5, %v1188_v3  ;;  %v1193_v13 = vsel %vm284_vm1, %v3059_v6, 0.0 }
 0x3ed   :  { %v1191_v9 = vsel %vm284_vm1, %v3062_v7, 0.0  ;;  %v2323_v10 = vpop.f32.mrb[32].mxu0 }
 0x3ee   :  { %v1192_v11 = vadd.f32 %v1191_v9, %v1190_v8  ;;  %v1141_v12 = vpop.f32.mrb[33].mxu0  ;;  %v1147_v14 = vadd.f32 %v2323_v10, %v3014_v18 }
 0x3ef   :  { %v1142_v31 = vadd.f32 %v3014_v18, %v1141_v12 }
 0x3f0   :  { %v1194_v32 = vadd.f32 %v1193_v13, %v1192_v11  ;;  %v1197_v37 = vsel %vm284_vm1, %v1147_v14, 0.0 }
 0x3f1   :  { %v1195_v33 = vsel %vm284_vm1, %v1142_v31, 0.0  ;;  %v2326_v34 = vpop.f32.mrb[34].mxu0 }
 0x3f2   :  { %v1196_v35 = vadd.f32 %v1195_v33, %v1194_v32  ;;  %v1151_v36 = vpop.f32.mrb[35].mxu0  ;;  %v1157_v38 = vadd.f32 %v2326_v34, %v3014_v18 }
 0x3f3   :  { %v1152_v39 = vadd.f32 %v3014_v18, %v1151_v36 }
 0x3f4   :  { %v1198_v40 = vadd.f32 %v1197_v37, %v1196_v35  ;;  %v1201_v45 = vsel %vm284_vm1, %v1157_v38, 0.0 }
 0x3f5   :  { %v1199_v41 = vsel %vm284_vm1, %v1152_v39, 0.0  ;;  %v2329_v42 = vpop.f32.mrb[36].mxu0 }
 0x3f6   :  { %v1200_v43 = vadd.f32 %v1199_v41, %v1198_v40  ;;  %v1161_v44 = vpop.f32.mrb[37].mxu0  ;;  %v1167_v46 = vadd.f32 %v2329_v42, %v3014_v18 }
 0x3f7   :  { %v1162_v47 = vadd.f32 %v3014_v18, %v1161_v44 }
 0x3f8   :  { %v1202_v48 = vadd.f32 %v1201_v45, %v1200_v43  ;;  %v1205_v16 = vsel %vm284_vm1, %v1167_v46, 0.0 }
 0x3f9   :  { %v1203_v49 = vsel %vm284_vm1, %v1162_v47, 0.0  ;;  %v2332_v50 = vpop.f32.mrb[38].mxu0 }
 0x3fa   :  { %v1204_v29 = vadd.f32 %v1203_v49, %v1202_v48  ;;  %v1171_v15 = vpop.f32.mrb[39].mxu0  ;;  %v1177_v17 = vadd.f32 %v2332_v50, %v3014_v18 }
 0x3fb   :  { %v1172_v19 = vadd.f32 %v3014_v18, %v1171_v15  ;;  %v2457_v18 = vpack.c.bf16 %v1543_v53, %v1542_v22 }
 0x3fc   :  { %v1206_v21 = vadd.f32 %v1205_v16, %v1204_v29  ;;  %v1209_v24 = vsel %vm284_vm1, %v1177_v17, 0.0 }
 0x3fd   :  { %v1207_v25 = vsel %vm284_vm1, %v1172_v19, 0.0  ;;  %2458 = vmatprep.subr.bf16.mxu0 %v2457_v18 }
 0x3fe   :  { %v1208_v26 = vadd.f32 %v1207_v25, %v1206_v21  ;;  %2460 = vmatpush3.bf16.msra.mxu0 %v2457_v18 }
 0x3ff   :  { %2462 = vmatprep.subr.bf16.mxu0 %v2461_v54 }
 0x400   :  { %v1210_v51 = vadd.f32 %v1209_v24, %v1208_v26 }
 0x402   :  { %v1211_v55 = vrot.slane %v1210_v51, 4  ;;  %2464 = vmatpush3.bf16.msra.mxu0 %v2461_v54 }
 0x404   :  { %v1212_v56 = vadd.f32 %v1211_v55, %v1210_v51 }
 0x406   :  { %v1213_v57 = vrot.slane %v1212_v56, 2 }
 0x408   :  { %v1214_v58 = vadd.f32 %v1213_v57, %v1212_v56 }
 0x40a   :  { %v1215_v61 = vrot.slane %v1214_v58, 1 }
 0x40c   :  { %v1216_v62 = vadd.f32 %v1215_v61, %v1214_v58 }
 0x40e   :  { %v1217_v63 = vmul.f32 0.0078125, %v1216_v62 }
 0x410   :  { %v3097_v0 = vsub.f32 %v3020_v23, %v1217_v63  ;;  %v3100_v1 = vsub.f32 %v3017_v20, %v1217_v63  ;;  %v3103_v2 = vsub.f32 %v3030_v27, %v1217_v63  ;;  %v3106_v3 = vsub.f32 %v3027_v28, %v1217_v63 }
 0x411   :  { %v3109_v4 = vsub.f32 %v3049_v60, %v1217_v63  ;;  %v3112_v5 = vsub.f32 %v3046_v59, %v1217_v63  ;;  %v3115_v8 = vsub.f32 %v3062_v7, %v1217_v63  ;;  %v3118_v23 = vsub.f32 %v3059_v6, %v1217_v63 }
 0x412   :  { %v3120_v20 = vsub.f32 %v1142_v31, %v1217_v63  ;;  %v3122_v9 = vsub.f32 %v1147_v14, %v1217_v63  ;;  %v3124_v27 = vsub.f32 %v1152_v39, %v1217_v63  ;;  %v3126_v28 = vsub.f32 %v1157_v38, %v1217_v63 }
 0x413   :  { %v3128_v10 = vsub.f32 %v1162_v47, %v1217_v63  ;;  %v3130_v60 = vsub.f32 %v1167_v46, %v1217_v63  ;;  %v3132_v59 = vsub.f32 %v1172_v19, %v1217_v63  ;;  %v3134_v11 = vsub.f32 %v1177_v17, %v1217_v63 }
 0x414   :  { %v1234_v6 = vmul.f32 %v3097_v0, %v3097_v0  ;;  %v1235_v7 = vmul.f32 %v3100_v1, %v3100_v1  ;;  %v1236_v12 = vmul.f32 %v3103_v2, %v3103_v2  ;;  %v1237_v13 = vmul.f32 %v3106_v3, %v3106_v3 }
 0x415   :  { %v1238_v33 = vmul.f32 %v3109_v4, %v3109_v4  ;;  %v1239_v36 = vmul.f32 %v3112_v5, %v3112_v5  ;;  %v1240_v39 = vmul.f32 %v3115_v8, %v3115_v8  ;;  %v1241_v42 = vmul.f32 %v3118_v23, %v3118_v23 }
 0x416   :  { %v1250_v14 = vsel %vm284_vm1, %v1234_v6, 0.0  ;;  %v1251_v31 = vsel %vm284_vm1, %v1235_v7, 0.0  ;;  %v1253_v34 = vsel %vm284_vm1, %v1236_v12, 0.0  ;;  %v1255_v37 = vsel %vm284_vm1, %v1237_v13, 0.0 }
 0x417   :  { %v1252_v32 = vadd.f32 %v1251_v31, %v1250_v14  ;;  %v1257_v40 = vsel %vm284_vm1, %v1238_v33, 0.0  ;;  %v1259_v43 = vsel %vm284_vm1, %v1239_v36, 0.0  ;;  %v1242_v45 = vmul.f32 %v3120_v20, %v3120_v20 }
 0x418   :  { %v1261_v46 = vsel %vm284_vm1, %v1240_v39, 0.0  ;;  %v1243_v48 = vmul.f32 %v3122_v9, %v3122_v9  ;;  %v1263_v49 = vsel %vm284_vm1, %v1241_v42, 0.0  ;;  %v1244_v29 = vmul.f32 %v3124_v27, %v3124_v27 }
 0x419   :  { %v1254_v35 = vadd.f32 %v1253_v34, %v1252_v32  ;;  %v1265_v15 = vsel %vm284_vm1, %v1242_v45, 0.0  ;;  %v1245_v17 = vmul.f32 %v3126_v28, %v3126_v28  ;;  %v1246_v25 = vmul.f32 %v3128_v10, %v3128_v10 }
 0x41a   :  { %v1267_v19 = vsel %vm284_vm1, %v1243_v48, 0.0  ;;  %v1269_v26 = vsel %vm284_vm1, %v1244_v29, 0.0  ;;  %v1247_v22 = vmul.f32 %v3130_v60, %v3130_v60  ;;  %v1248_v51 = vmul.f32 %v3132_v59, %v3132_v59  ;;  %v3222_v29 = vld [vmem:[%s3413_s9] ss:$0 sm:$0xff] }
 0x41b   :  { %v1256_v38 = vadd.f32 %v1255_v37, %v1254_v35  ;;  %v1271_v53 = vsel %vm284_vm1, %v1245_v17, 0.0  ;;  %v1273_v18 = vsel %vm284_vm1, %v1246_v25, 0.0  ;;  %v1249_v54 = vmul.f32 %v3134_v11, %v3134_v11 }
 0x41c   :  { %v1275_v55 = vsel %vm284_vm1, %v1247_v22, 0.0  ;;  %v1277_v57 = vsel %vm284_vm1, %v1248_v51, 0.0 }
 0x41d   :  { %v1258_v41 = vadd.f32 %v1257_v40, %v1256_v38  ;;  %v1279_v61 = vsel %vm284_vm1, %v1249_v54, 0.0 }
 0x41f   :  { %v1260_v44 = vadd.f32 %v1259_v43, %v1258_v41 }
 0x421   :  { %v1262_v47 = vadd.f32 %v1261_v46, %v1260_v44 }
 0x423   :  { %v1264_v50 = vadd.f32 %v1263_v49, %v1262_v47 }
 0x425   :  { %v1266_v16 = vadd.f32 %v1265_v15, %v1264_v50  ;;  %v19_v50 = vstv %s3412_s11 }
 0x426   :  { %20 = vst [vmem:[#allocation2] sm:$0x1] %v19_v50 }
 0x427   :  { %v1268_v21 = vadd.f32 %v1267_v19, %v1266_v16 }
 0x429   :  { %v1270_v24 = vadd.f32 %v1269_v26, %v1268_v21 }
 0x42b   :  { %v1272_v30 = vadd.f32 %v1271_v53, %v1270_v24 }
 0x42d   :  { %v1274_v52 = vadd.f32 %v1273_v18, %v1272_v30 }
 0x42f   :  { %v1276_v56 = vadd.f32 %v1275_v55, %v1274_v52 }
 0x431   :  { %v1278_v58 = vadd.f32 %v1277_v57, %v1276_v56 }
 0x433   :  { %v1280_v62 = vadd.f32 %v1279_v61, %v1278_v58 }
 0x435   :  { %v1281_v63 = vrot.slane %v1280_v62, 4 }
 0x437   :  { %v1282_v6 = vadd.f32 %v1281_v63, %v1280_v62 }
 0x439   :  { %v1283_v7 = vrot.slane %v1282_v6, 2 }
 0x43b   :  { %v1284_v12 = vadd.f32 %v1283_v7, %v1282_v6 }
 0x43d   :  { %v1285_v13 = vrot.slane %v1284_v12, 1 }
 0x43f   :  { %v1286_v14 = vadd.f32 %v1285_v13, %v1284_v12 }
 0x441   :  { %v1287_v31 = vmul.f32 0.0078125, %v1286_v14 }
 0x443   :  { %v1288_v32 = vadd.f32 1e-05, %v1287_v31 }
 0x445   :  { %2501 = vrsqrt.f32 %v1288_v32 }
 0x44f   :  { %v2502_v33 = vpop.eup %2501 }
 0x450   :  { %v1290_v34 = vmul.f32 %v2502_v33, %v3097_v0  ;;  %v1291_v35 = vmul.f32 %v2502_v33, %v3100_v1  ;;  %v1292_v36 = vmul.f32 %v2502_v33, %v3103_v2  ;;  %v1293_v37 = vmul.f32 %v2502_v33, %v3106_v3 }
 0x451   :  { %v1294_v38 = vmul.f32 %v2502_v33, %v3109_v4  ;;  %v1295_v39 = vmul.f32 %v2502_v33, %v3112_v5  ;;  %v1296_v40 = vmul.f32 %v2502_v33, %v3115_v8  ;;  %v1297_v41 = vmul.f32 %v2502_v33, %v3118_v23 }
 0x452   :  { %v1298_v42 = vmul.f32 %v2502_v33, %v3120_v20  ;;  %v1299_v43 = vmul.f32 %v2502_v33, %v3122_v9  ;;  %v1300_v0 = vmul.f32 %v2502_v33, %v3124_v27  ;;  %v1301_v1 = vmul.f32 %v2502_v33, %v3126_v28 }
 0x453   :  { %v1302_v2 = vmul.f32 %v2502_v33, %v3128_v10  ;;  %v1303_v3 = vmul.f32 %v2502_v33, %v3130_v60  ;;  %v1304_v4 = vmul.f32 %v2502_v33, %v3132_v59  ;;  %v1305_v5 = vmul.f32 %v2502_v33, %v3134_v11 }
 0x454   :  { %2503 = vtanh.f32 %v1290_v34 }
 0x455   :  { %2505 = vtanh.f32 %v1291_v35 }
 0x456   :  { %2507 = vtanh.f32 %v1292_v36 }
 0x457   :  { %2509 = vtanh.f32 %v1293_v37 }
 0x458   :  { %2511 = vtanh.f32 %v1294_v38 }
 0x459   :  { %2513 = vtanh.f32 %v1295_v39 }
 0x45a   :  { %2515 = vtanh.f32 %v1296_v40 }
 0x45b   :  { %2517 = vtanh.f32 %v1297_v41 }
 0x45c   :  { %2519 = vtanh.f32 %v1298_v42 }
 0x45d   :  { %2521 = vtanh.f32 %v1299_v43 }
 0x45e   :  { %v2504_v8 = vpop.eup %2503  ;;  %2523 = vtanh.f32 %v1300_v0 }
 0x45f   :  { %v2506_v23 = vpop.eup %2505  ;;  %2341 = vmatprep.mubr.msk.f32.mxu1 %vm284_vm1, %v2504_v8  ;;  %2525 = vtanh.f32 %v1301_v1 }
 0x460   :  { %v2508_v20 = vpop.eup %2507  ;;  %2342 = vmatmul.mubr.msk.f32.vlgmr.msra.gmra.mrb[40].mxu1 %vm284_vm1, %v2506_v23  ;;  %2527 = vtanh.f32 %v1302_v2 }
 0x461   :  { %2344 = vmatprep.mubr.msk.f32.mxu1 %vm284_vm1, %v2508_v20  ;;  %v2510_v9 = vpop.eup %2509  ;;  %2529 = vtanh.f32 %v1303_v3  ;;  %v3320_v20 = vld [vmem:[#allocation2] ss:$0 sm:$0xff] }
 0x462   :  { %v2512_v27 = vpop.eup %2511  ;;  %2531 = vtanh.f32 %v1304_v4 }
 0x463   :  { %v2514_v28 = vpop.eup %2513  ;;  %2533 = vtanh.f32 %v1305_v5 }
 0x464   :  { %2345 = vmatmul.mubr.msk.f32.gmra.mrb[42].mxu1 %vm284_vm1, %v2510_v9  ;;  %v2516_v10 = vpop.eup %2515 }
 0x465   :  { %2347 = vmatprep.mubr.msk.f32.mxu1 %vm284_vm1, %v2512_v27  ;;  %v2518_v60 = vpop.eup %2517 }
 0x466   :  { %v2520_v59 = vpop.eup %2519 }
 0x467   :  { %v2522_v11 = vpop.eup %2521 }
 0x468   :  { %2348 = vmatmul.mubr.msk.f32.gmra.mrb[44].mxu1 %vm284_vm1, %v2514_v28  ;;  %v2524_v44 = vpop.eup %2523 }
 0x469   :  { %2350 = vmatprep.mubr.msk.f32.mxu1 %vm284_vm1, %v2516_v10  ;;  %v2526_v45 = vpop.eup %2525 }
 0x46a   :  { %v2528_v46 = vpop.eup %2527 }
 0x46b   :  { %v2530_v47 = vpop.eup %2529 }
 0x46c   :  { %2351 = vmatmul.mubr.msk.f32.gmra.mrb[46].mxu1 %vm284_vm1, %v2518_v60  ;;  %v2532_v48 = vpop.eup %2531 }
 0x46d   :  { %2353 = vmatprep.mubr.msk.f32.mxu1 %vm284_vm1, %v2520_v59  ;;  %v2534_v49 = vpop.eup %2533 }
 0x470   :  { %2354 = vmatmul.mubr.msk.f32.gmra.mrb[48].mxu1 %vm284_vm1, %v2522_v11 }
 0x471   :  { %2356 = vmatprep.mubr.msk.f32.mxu1 %vm284_vm1, %v2524_v44 }
 0x474   :  { %2357 = vmatmul.mubr.msk.f32.gmra.mrb[50].mxu1 %vm284_vm1, %v2526_v45 }
 0x475   :  { %2359 = vmatprep.mubr.msk.f32.mxu1 %vm284_vm1, %v2528_v46 }
 0x478   :  { %2360 = vmatmul.mubr.msk.f32.gmra.mrb[52].mxu1 %vm284_vm1, %v2530_v47 }
 0x479   :  { %2362 = vmatprep.mubr.msk.f32.mxu1 %vm284_vm1, %v2532_v48 }
 0x47c   :  { %2363 = vmatmul.mubr.msk.f32.gmra.mrb[54].mxu1 %vm284_vm1, %v2534_v49 }
 0x533   :  { %v2343_v15 = vpop.f32.mrb[40].mxu1 }
 0x534   :  { %v1453_v16 = vadd.f32 %v2343_v15, %v3222_v29  ;;  %v1447_v17 = vpop.f32.mrb[41].mxu1 }
 0x535   :  { %v1448_v19 = vadd.f32 %v3222_v29, %v1447_v17 }
 0x536   :  { %v1527_v21 = vmax.f32 %v1453_v16, 0.0 }
 0x537   :  { %v1526_v25 = vmax.f32 %v1448_v19, 0.0  ;;  %v2346_v26 = vpop.f32.mrb[42].mxu1 }
 0x538   :  { %1860 = vst.msk [vmem:[%s3414_s13 + $0x8] sm:$0xff] %vm284_vm1, %v1527_v21  ;;  %v1463_v24 = vadd.f32 %v2346_v26, %v3222_v29  ;;  %v1457_v22 = vpop.f32.mrb[43].mxu1 }
 0x539   :  { %1859 = vst.msk [vmem:[%s3414_s13] sm:$0xff] %vm284_vm1, %v1526_v25  ;;  %v1458_v53 = vadd.f32 %v3222_v29, %v1457_v22  ;;  %2373 = vmatprep.mubr.msk.f32.mxu0 %vm284_vm1, %v1526_v25 }
 0x53a   :  { %v1529_v30 = vmax.f32 %v1463_v24, 0.0  ;;  %2374 = vmatmul.mubr.msk.f32.vlgmr.msra.gmra.mrb[40].mxu0 %vm284_vm1, %v1527_v21 }
 0x53b   :  { %v1528_v51 = vmax.f32 %v1458_v53, 0.0  ;;  %v2349_v18 = vpop.f32.mrb[44].mxu1 }
 0x53c   :  { %1862 = vst.msk [vmem:[%s3414_s13 + $0x18] sm:$0xff] %vm284_vm1, %v1529_v30  ;;  %v1473_v52 = vadd.f32 %v2349_v18, %v3222_v29  ;;  %v1467_v54 = vpop.f32.mrb[45].mxu1 }
 0x53d   :  { %1861 = vst.msk [vmem:[%s3414_s13 + $0x10] sm:$0xff] %vm284_vm1, %v1528_v51  ;;  %v1468_v55 = vadd.f32 %v3222_v29, %v1467_v54  ;;  %2376 = vmatprep.mubr.msk.f32.mxu0 %vm284_vm1, %v1528_v51 }
 0x53e   :  { %v1531_v56 = vmax.f32 %v1473_v52, 0.0  ;;  %2377 = vmatmul.mubr.msk.f32.gmra.mrb[42].mxu0 %vm284_vm1, %v1529_v30 }
 0x53f   :  { %v1530_v57 = vmax.f32 %v1468_v55, 0.0  ;;  %v2352_v58 = vpop.f32.mrb[46].mxu1 }
 0x540   :  { %1864 = vst.msk [vmem:[%s3414_s13 + $0x28] sm:$0xff] %vm284_vm1, %v1531_v56  ;;  %v1483_v61 = vadd.f32 %v2352_v58, %v3222_v29  ;;  %v1477_v62 = vpop.f32.mrb[47].mxu1 }
 0x541   :  { %1863 = vst.msk [vmem:[%s3414_s13 + $0x20] sm:$0xff] %vm284_vm1, %v1530_v57  ;;  %v1478_v63 = vadd.f32 %v3222_v29, %v1477_v62  ;;  %2379 = vmatprep.mubr.msk.f32.mxu0 %vm284_vm1, %v1530_v57 }
 0x542   :  { %v1533_v6 = vmax.f32 %v1483_v61, 0.0  ;;  %2380 = vmatmul.mubr.msk.f32.gmra.mrb[44].mxu0 %vm284_vm1, %v1531_v56 }
 0x543   :  { %v1532_v7 = vmax.f32 %v1478_v63, 0.0  ;;  %v2355_v12 = vpop.f32.mrb[48].mxu1 }
 0x544   :  { %1866 = vst.msk [vmem:[%s3414_s13 + $0x38] sm:$0xff] %vm284_vm1, %v1533_v6  ;;  %v1493_v13 = vadd.f32 %v2355_v12, %v3222_v29  ;;  %v1487_v14 = vpop.f32.mrb[49].mxu1 }
 0x545   :  { %1865 = vst.msk [vmem:[%s3414_s13 + $0x30] sm:$0xff] %vm284_vm1, %v1532_v7  ;;  %v1488_v31 = vadd.f32 %v3222_v29, %v1487_v14  ;;  %2382 = vmatprep.mubr.msk.f32.mxu0 %vm284_vm1, %v1532_v7 }
 0x546   :  { %v1535_v32 = vmax.f32 %v1493_v13, 0.0  ;;  %2383 = vmatmul.mubr.msk.f32.gmra.mrb[46].mxu0 %vm284_vm1, %v1533_v6 }
 0x547   :  { %v1534_v33 = vmax.f32 %v1488_v31, 0.0  ;;  %v2358_v34 = vpop.f32.mrb[50].mxu1 }
 0x548   :  { %1868 = vst.msk [vmem:[%s3414_s13 + $0x48] sm:$0xff] %vm284_vm1, %v1535_v32  ;;  %v1503_v35 = vadd.f32 %v2358_v34, %v3222_v29  ;;  %v1497_v36 = vpop.f32.mrb[51].mxu1 }
 0x549   :  { %1867 = vst.msk [vmem:[%s3414_s13 + $0x40] sm:$0xff] %vm284_vm1, %v1534_v33  ;;  %v1498_v37 = vadd.f32 %v3222_v29, %v1497_v36  ;;  %2385 = vmatprep.mubr.msk.f32.mxu0 %vm284_vm1, %v1534_v33 }
 0x54a   :  { %v1537_v38 = vmax.f32 %v1503_v35, 0.0  ;;  %2386 = vmatmul.mubr.msk.f32.gmra.mrb[48].mxu0 %vm284_vm1, %v1535_v32 }
 0x54b   :  { %v1536_v39 = vmax.f32 %v1498_v37, 0.0  ;;  %v2361_v40 = vpop.f32.mrb[52].mxu1 }
 0x54c   :  { %1870 = vst.msk [vmem:[%s3414_s13 + $0x58] sm:$0xff] %vm284_vm1, %v1537_v38  ;;  %v1513_v41 = vadd.f32 %v2361_v40, %v3222_v29  ;;  %v1507_v42 = vpop.f32.mrb[53].mxu1 }
 0x54d   :  { %1869 = vst.msk [vmem:[%s3414_s13 + $0x50] sm:$0xff] %vm284_vm1, %v1536_v39  ;;  %v1508_v43 = vadd.f32 %v3222_v29, %v1507_v42  ;;  %2388 = vmatprep.mubr.msk.f32.mxu0 %vm284_vm1, %v1536_v39 }
 0x54e   :  { %v1539_v0 = vmax.f32 %v1513_v41, 0.0  ;;  %2389 = vmatmul.mubr.msk.f32.gmra.mrb[50].mxu0 %vm284_vm1, %v1537_v38 }
 0x54f   :  { %v1538_v1 = vmax.f32 %v1508_v43, 0.0  ;;  %v2364_v2 = vpop.f32.mrb[54].mxu1 }
 0x550   :  { %1872 = vst.msk [vmem:[%s3414_s13 + $0x68] sm:$0xff] %vm284_vm1, %v1539_v0  ;;  %v1523_v3 = vadd.f32 %v2364_v2, %v3222_v29  ;;  %v1517_v4 = vpop.f32.mrb[55].mxu1 }
 0x551   :  { %1871 = vst.msk [vmem:[%s3414_s13 + $0x60] sm:$0xff] %vm284_vm1, %v1538_v1  ;;  %v1518_v5 = vadd.f32 %v3222_v29, %v1517_v4  ;;  %2391 = vmatprep.mubr.msk.f32.mxu0 %vm284_vm1, %v1538_v1 }
 0x552   :  { %v1541_v8 = vmax.f32 %v1523_v3, 0.0  ;;  %2392 = vmatmul.mubr.msk.f32.gmra.mrb[52].mxu0 %vm284_vm1, %v1539_v0 }
 0x553   :  { %v1540_v23 = vmax.f32 %v1518_v5, 0.0 }
 0x554   :  { %1874 = vst.msk [vmem:[%s3414_s13 + $0x78] sm:$0xff] %vm284_vm1, %v1541_v8 }
 0x555   :  { %1873 = vst.msk [vmem:[%s3414_s13 + $0x70] sm:$0xff] %vm284_vm1, %v1540_v23  ;;  %2394 = vmatprep.mubr.msk.f32.mxu0 %vm284_vm1, %v1540_v23 }
 0x556   :  { %2395 = vmatmul.mubr.msk.f32.gmra.mrb[54].mxu0 %vm284_vm1, %v1541_v8 }
 0x60d   :  { %v2375_v9 = vpop.f32.mrb[40].mxu0 }
 0x60e   :  { %v1673_v27 = vadd.f32 %v2375_v9, %v3320_v20  ;;  %v1667_v28 = vpop.f32.mrb[41].mxu0 }
 0x60f   :  { %v1668_v10 = vadd.f32 %v3320_v20, %v1667_v28 }
 0x610   :  { %v2000_v60 = vmul.f32 -1.442695, %v1673_v27 }
 0x611   :  { %v1999_v59 = vmul.f32 -1.442695, %v1668_v10  ;;  %v2378_v11 = vpop.f32.mrb[42].mxu0 }
 0x612   :  { %2535 = vpow2.f32 %v2000_v60  ;;  %v1683_v44 = vadd.f32 %v2378_v11, %v3320_v20  ;;  %v1677_v45 = vpop.f32.mrb[43].mxu0 }
 0x613   :  { %2537 = vpow2.f32 %v1999_v59  ;;  %v1678_v46 = vadd.f32 %v3320_v20, %v1677_v45 }
 0x614   :  { %v2002_v47 = vmul.f32 -1.442695, %v1683_v44 }
 0x615   :  { %v2001_v48 = vmul.f32 -1.442695, %v1678_v46  ;;  %v2381_v49 = vpop.f32.mrb[44].mxu0 }
 0x616   :  { %2539 = vpow2.f32 %v2002_v47  ;;  %v1693_v50 = vadd.f32 %v2381_v49, %v3320_v20  ;;  %v1687_v29 = vpop.f32.mrb[45].mxu0 }
 0x617   :  { %2541 = vpow2.f32 %v2001_v48  ;;  %v1688_v15 = vadd.f32 %v3320_v20, %v1687_v29 }
 0x618   :  { %v2004_v16 = vmul.f32 -1.442695, %v1693_v50 }
 0x619   :  { %v2003_v17 = vmul.f32 -1.442695, %v1688_v15  ;;  %v2384_v19 = vpop.f32.mrb[46].mxu0 }
 0x61a   :  { %2543 = vpow2.f32 %v2004_v16  ;;  %v1703_v21 = vadd.f32 %v2384_v19, %v3320_v20  ;;  %v1697_v25 = vpop.f32.mrb[47].mxu0 }
 0x61b   :  { %2545 = vpow2.f32 %v2003_v17  ;;  %v1698_v26 = vadd.f32 %v3320_v20, %v1697_v25 }
 0x61c   :  { %v2536_v24 = vpop.eup %2535  ;;  %v2006_v22 = vmul.f32 -1.442695, %v1703_v21 }
 0x61d   :  { %v2538_v53 = vpop.eup %2537  ;;  %v1795_v30 = vadd.f32 1.0, %v2536_v24  ;;  %v2005_v51 = vmul.f32 -1.442695, %v1698_v26  ;;  %v2387_v18 = vpop.f32.mrb[48].mxu0 }
 0x61e   :  { %v1794_v52 = vadd.f32 1.0, %v2538_v53  ;;  %2547 = vpow2.f32 %v2006_v22  ;;  %v1713_v54 = vadd.f32 %v2387_v18, %v3320_v20  ;;  %v1707_v55 = vpop.f32.mrb[49].mxu0 }
 0x61f   :  { %2549 = vrcp.f32 %v1795_v30  ;;  %v1708_v56 = vadd.f32 %v3320_v20, %v1707_v55 }
 0x620   :  { %v2540_v57 = vpop.eup %2539  ;;  %2551 = vrcp.f32 %v1794_v52  ;;  %v2008_v58 = vmul.f32 -1.442695, %v1713_v54 }
 0x621   :  { %v2542_v61 = vpop.eup %2541  ;;  %v1797_v62 = vadd.f32 1.0, %v2540_v57  ;;  %2553 = vpow2.f32 %v2005_v51  ;;  %v2007_v63 = vmul.f32 -1.442695, %v1708_v56  ;;  %v2390_v6 = vpop.f32.mrb[50].mxu0 }
 0x622   :  { %v1796_v7 = vadd.f32 1.0, %v2542_v61  ;;  %2555 = vpow2.f32 %v2008_v58  ;;  %v1723_v12 = vadd.f32 %v2390_v6, %v3320_v20  ;;  %v1717_v13 = vpop.f32.mrb[51].mxu0 }
 0x623   :  { %2557 = vrcp.f32 %v1797_v62  ;;  %v1718_v14 = vadd.f32 %v3320_v20, %v1717_v13 }
 0x624   :  { %v2544_v31 = vpop.eup %2543  ;;  %2559 = vrcp.f32 %v1796_v7  ;;  %v2010_v32 = vmul.f32 -1.442695, %v1723_v12 }
 0x625   :  { %v2546_v33 = vpop.eup %2545  ;;  %v1799_v34 = vadd.f32 1.0, %v2544_v31  ;;  %2561 = vpow2.f32 %v2007_v63  ;;  %v2009_v35 = vmul.f32 -1.442695, %v1718_v14  ;;  %v2393_v36 = vpop.f32.mrb[52].mxu0 }
 0x626   :  { %v1798_v37 = vadd.f32 1.0, %v2546_v33  ;;  %2563 = vpow2.f32 %v2010_v32  ;;  %v1733_v38 = vadd.f32 %v2393_v36, %v3320_v20  ;;  %v1727_v39 = vpop.f32.mrb[53].mxu0 }
 0x627   :  { %2565 = vrcp.f32 %v1799_v34  ;;  %v1728_v40 = vadd.f32 %v3320_v20, %v1727_v39 }
 0x628   :  { %v2548_v41 = vpop.eup %2547  ;;  %2567 = vrcp.f32 %v1798_v37  ;;  %v2012_v42 = vmul.f32 -1.442695, %v1733_v38 }
 0x629   :  { %v2550_v43 = vpop.eup %2549  ;;  %v1801_v0 = vadd.f32 1.0, %v2548_v41  ;;  %2569 = vpow2.f32 %v2009_v35  ;;  %v2011_v1 = vmul.f32 -1.442695, %v1728_v40  ;;  %v2396_v2 = vpop.f32.mrb[54].mxu0 }
 0x62a   :  { %v2552_v3 = vpop.eup %2551  ;;  %1844 = vst.msk [vmem:[%s3415_s12 + $0x8] sm:$0xff] %vm1842_vm3, %v2550_v43  ;;  %2571 = vpow2.f32 %v2012_v42  ;;  %v1743_v4 = vadd.f32 %v2396_v2, %v3320_v20  ;;  %v1737_v5 = vpop.f32.mrb[55].mxu0 }
 0x62b   :  { %v2554_v8 = vpop.eup %2553  ;;  %1843 = vst.msk [vmem:[%s3415_s12] sm:$0xff] %vm1842_vm3, %v2552_v3  ;;  %2573 = vrcp.f32 %v1801_v0  ;;  %v1738_v23 = vadd.f32 %v3320_v20, %v1737_v5 }
 0x62c   :  { %v2556_v9 = vpop.eup %2555  ;;  %v1800_v27 = vadd.f32 1.0, %v2554_v8  ;;  %2575 = vpow2.f32 %v2011_v1  ;;  %v2014_v28 = vmul.f32 -1.442695, %v1743_v4 }
 0x62d   :  { %v2558_v10 = vpop.eup %2557  ;;  %v1803_v60 = vadd.f32 1.0, %v2556_v9  ;;  %v2013_v59 = vmul.f32 -1.442695, %v1738_v23 }
 0x62e   :  { %v2560_v11 = vpop.eup %2559  ;;  %1846 = vst.msk [vmem:[%s3415_s12 + $0x18] sm:$0xff] %vm1842_vm3, %v2558_v10  ;;  %2577 = vrcp.f32 %v1800_v27 }
 0x62f   :  { %v2562_v44 = vpop.eup %2561  ;;  %1845 = vst.msk [vmem:[%s3415_s12 + $0x10] sm:$0xff] %vm1842_vm3, %v2560_v11  ;;  %2579 = vrcp.f32 %v1803_v60 }
 0x630   :  { %v2564_v20 = vpop.eup %2563  ;;  %v1802_v45 = vadd.f32 1.0, %v2562_v44  ;;  %2581 = vpow2.f32 %v2014_v28 }
 0x631   :  { %v2566_v46 = vpop.eup %2565  ;;  %v1805_v47 = vadd.f32 1.0, %v2564_v20  ;;  %2583 = vpow2.f32 %v2013_v59 }
 0x632   :  { %v2568_v48 = vpop.eup %2567  ;;  %1848 = vst.msk [vmem:[%s3415_s12 + $0x28] sm:$0xff] %vm1842_vm3, %v2566_v46  ;;  %2585 = vrcp.f32 %v1802_v45 }
 0x633   :  { %v2570_v49 = vpop.eup %2569  ;;  %1847 = vst.msk [vmem:[%s3415_s12 + $0x20] sm:$0xff] %vm1842_vm3, %v2568_v48  ;;  %2587 = vrcp.f32 %v1805_v47 }
 0x634   :  { %v2572_v50 = vpop.eup %2571  ;;  %v1804_v29 = vadd.f32 1.0, %v2570_v49 }
 0x635   :  { %v2574_v15 = vpop.eup %2573  ;;  %v1807_v16 = vadd.f32 1.0, %v2572_v50 }
 0x636   :  { %v2576_v17 = vpop.eup %2575  ;;  %1850 = vst.msk [vmem:[%s3415_s12 + $0x38] sm:$0xff] %vm1842_vm3, %v2574_v15  ;;  %2589 = vrcp.f32 %v1804_v29 }
 0x637   :  { %2591 = vrcp.f32 %v1807_v16  ;;  %v1806_v19 = vadd.f32 1.0, %v2576_v17 }
 0x638   :  { %v2578_v21 = vpop.eup %2577 }
 0x639   :  { %v2580_v25 = vpop.eup %2579  ;;  %1849 = vst.msk [vmem:[%s3415_s12 + $0x30] sm:$0xff] %vm1842_vm3, %v2578_v21  ;;  %2593 = vrcp.f32 %v1806_v19 }
 0x63a   :  { %v2582_v26 = vpop.eup %2581  ;;  %1852 = vst.msk [vmem:[%s3415_s12 + $0x48] sm:$0xff] %vm1842_vm3, %v2580_v25 }
 0x63b   :  { %v2584_v24 = vpop.eup %2583  ;;  %v1809_v22 = vadd.f32 1.0, %v2582_v26 }
 0x63c   :  { %v2586_v53 = vpop.eup %2585  ;;  %v1808_v30 = vadd.f32 1.0, %v2584_v24 }
 0x63d   :  { %v2588_v51 = vpop.eup %2587  ;;  %1851 = vst.msk [vmem:[%s3415_s12 + $0x40] sm:$0xff] %vm1842_vm3, %v2586_v53  ;;  %2595 = vrcp.f32 %v1809_v22 }
 0x63e   :  { %1854 = vst.msk [vmem:[%s3415_s12 + $0x58] sm:$0xff] %vm1842_vm3, %v2588_v51  ;;  %2597 = vrcp.f32 %v1808_v30 }
 0x640   :  { %v2590_v18 = vpop.eup %2589 }
 0x641   :  { %v2592_v52 = vpop.eup %2591  ;;  %1853 = vst.msk [vmem:[%s3415_s12 + $0x50] sm:$0xff] %vm1842_vm3, %v2590_v18 }
 0x642   :  { %1856 = vst.msk [vmem:[%s3415_s12 + $0x68] sm:$0xff] %vm1842_vm3, %v2592_v52 }
 0x643   :  { %v2594_v54 = vpop.eup %2593 }
 0x644   :  { %1855 = vst.msk [vmem:[%s3415_s12 + $0x60] sm:$0xff] %vm1842_vm3, %v2594_v54 }
 0x647   :  { %v2596_v55 = vpop.eup %2595 }
 0x648   :  { %v2598_v56 = vpop.eup %2597  ;;  %1858 = vst.msk [vmem:[%s3415_s12 + $0x78] sm:$0xff] %vm1842_vm3, %v2596_v55 }
 0x649   :  { %1857 = vst.msk [vmem:[%s3415_s12 + $0x70] sm:$0xff] %vm1842_vm3, %v2598_v56 }

</bundles_post_ra>
